<compile_context>
chip_gen: v6e
topology: v6e:2x2x1
jax: 0.10.0
libtpu: 0.0.40
codegen_flags: <defaults>
</compile_context>

<pallas_src>
import functools

import jax
import jax.numpy as jnp
from jax import lax
from jax.experimental import pallas as pl
from jax.experimental.pallas import tpu as pltpu

BN_EPS = 1e-5                      # nn.BatchNorm2d default eps
_TILE_N = 2048                     # row tile for the fused BN+ReLU+projection
_VMEM_CAP = 32 * 1024 * 1024       # scoped-VMEM ceiling safe on v5e/v6e/v7x


def _vmem_limit(block_bytes):
    """Per-call scoped-VMEM budget: live blocks + 50% headroom, clamped."""
    return int(min(max(int(block_bytes * 1.5), 4 * 1024 * 1024), _VMEM_CAP))


# ----------------------------- Pallas kernels ------------------------------

def _conv3x3_stats_kernel(x_ref, scale_ref, shift_ref, w_ref,
                          y_ref, sum_ref, sq_ref, xpad_ref, *,
                          ho, wo, stride, apply_affine_relu):
    """Fused [prev-layer BN affine + ReLU] -> zero-pad -> 3x3 conv -> stats.

    x_ref:      (1, H, W, Cin)    raw previous conv output (or the input image).
    scale/shift:(1, Cin)          folded BatchNorm of the previous layer.
    w_ref:      (3, 3, Cin, Cout) bf16 conv weights (resident).
    y_ref:      (1, Ho*Wo, Cout)  raw (pre-BN) conv output for this image.
    sum_ref/sq_ref: (1, 1, Cout)  per-image channel sum / sum of squares.
    xpad_ref:   (H+2, W+2, Cin)   f32 VMEM scratch (zero halo == conv padding).
    """
    h_in = x_ref.shape[1]
    w_in = x_ref.shape[2]
    cin = x_ref.shape[3]
    cout = w_ref.shape[3]
    s = stride

    x = x_ref[0]                                              # (H, W, Cin)
    if apply_affine_relu:
        x = jnp.maximum(x * scale_ref[0] + shift_ref[0], 0.0)

    # Zero halo (pad=1) + interior.  Memset every step: the grid axis is
    # "parallel", so no pl.when(b == 0) init (each core must see zeros).
    xpad_ref[...] = jnp.zeros_like(xpad_ref)
    xpad_ref[pl.ds(1, h_in), pl.ds(1, w_in), :] = x

    # 3x3 conv as 9 whole-image matmuls: tap (di, dj) contributes
    #   xpad[s*io+di, s*jo+dj, :] @ w[di, dj]  for all (io, jo) at once.
    acc = jnp.zeros((ho * wo, cout), jnp.float32)
    for di in range(3):
        for dj in range(3):
            if s == 1:
                patch = xpad_ref[pl.ds(di, ho), pl.ds(dj, wo), :]
            else:
                patch = xpad_ref[pl.ds(di, ho, stride=s),
                                 pl.ds(dj, wo, stride=s), :]
            lhs = patch.reshape(ho * wo, cin).astype(jnp.bfloat16)
            acc = acc + jnp.dot(lhs, w_ref[di, dj],
                                preferred_element_type=jnp.float32)

    y_ref[0] = acc.astype(y_ref.dtype)
    # Single whole-block reductions (XLU) -> exact per-image partial stats.
    sum_ref[0] = jnp.sum(acc, axis=0, keepdims=True)
    sq_ref[0] = jnp.sum(acc * acc, axis=0, keepdims=True)


def _bn_relu_proj_kernel(y_ref, scale_ref, shift_ref, w_ref, b_ref, o_ref):
    """Folded BatchNorm + ReLU fused with the final 1x1 conv (linear + bias)."""
    h = jnp.maximum(y_ref[...] * scale_ref[...] + shift_ref[...], 0.0)
    o_ref[...] = (jnp.dot(h.astype(jnp.bfloat16), w_ref[...],
                          preferred_element_type=jnp.float32)
                  + b_ref[...]).astype(o_ref.dtype)


# ------------------------------ JAX glue ------------------------------------

def _conv3x3_layer(x_nhwc, scale, shift, w, *, apply_affine_relu):
    """One stem layer: fused prev-BN+ReLU + 3x3 conv + per-image batch stats."""
    b, h, w_sp, cin = x_nhwc.shape
    cout = w.shape[-1]
    stride = 2 if cin != cout else 1
    ho = (h + 2 - 3) // stride + 1
    wo = (w_sp + 2 - 3) // stride + 1

    kernel = functools.partial(_conv3x3_stats_kernel, ho=ho, wo=wo,
                               stride=stride,
                               apply_affine_relu=apply_affine_relu)

    block_bytes = (2 * 4 * h * w_sp * cin            # x block (double buffered)
                   + 2 * 4 * ho * wo * cout          # y block (double buffered)
                   + 4 * (h + 2) * (w_sp + 2) * cin  # pad scratch
                   + 2 * 9 * cin * cout + 8 * cin + 32 * cout)
    flops = 2 * b * ho * wo * 9 * cin * cout + 3 * b * h * w_sp * cin
    bytes_accessed = (4 * (x_nhwc.size + b * ho * wo * cout + 2 * b * cout
                           + 2 * cin) + 2 * w.size)

    y, ssum, ssq = pl.pallas_call(
        kernel,
        grid=(b,),
        in_specs=[
            pl.BlockSpec((1, h, w_sp, cin), lambda i: (i, 0, 0, 0)),
            pl.BlockSpec((1, cin), lambda i: (0, 0)),
            pl.BlockSpec((1, cin), lambda i: (0, 0)),
            pl.BlockSpec((3, 3, cin, cout), lambda i: (0, 0, 0, 0)),
        ],
        out_specs=[
            pl.BlockSpec((1, ho * wo, cout), lambda i: (i, 0, 0)),
            pl.BlockSpec((1, 1, cout), lambda i: (i, 0, 0)),
            pl.BlockSpec((1, 1, cout), lambda i: (i, 0, 0)),
        ],
        out_shape=[
            jax.ShapeDtypeStruct((b, ho * wo, cout), jnp.float32),
            jax.ShapeDtypeStruct((b, 1, cout), jnp.float32),
            jax.ShapeDtypeStruct((b, 1, cout), jnp.float32),
        ],
        scratch_shapes=[pltpu.VMEM((h + 2, w_sp + 2, cin), jnp.float32)],
        compiler_params=pltpu.CompilerParams(
            dimension_semantics=("parallel",),
            vmem_limit_bytes=_vmem_limit(block_bytes)),
        cost_estimate=pl.CostEstimate(flops=flops, transcendentals=0,
                                      bytes_accessed=bytes_accessed),
    )(x_nhwc, scale.reshape(1, cin), shift.reshape(1, cin),
      w.astype(jnp.bfloat16))
    return y, ssum, ssq, ho, wo


def _bn_relu_proj(yf, scale, shift, proj_w, proj_b):
    """Last-layer folded BN + ReLU fused with the final 1x1 projection."""
    n, c = yf.shape
    e = proj_w.shape[1]
    tile = min(_TILE_N, n)
    block_bytes = 2 * 4 * tile * c + 2 * 4 * tile * e + 2 * c * e + 8 * c + 4 * e
    return pl.pallas_call(
        _bn_relu_proj_kernel,
        grid=(pl.cdiv(n, tile),),
        in_specs=[
            pl.BlockSpec((tile, c), lambda i: (i, 0)),
            pl.BlockSpec((1, c), lambda i: (0, 0)),
            pl.BlockSpec((1, c), lambda i: (0, 0)),
            pl.BlockSpec((c, e), lambda i: (0, 0)),
            pl.BlockSpec((1, e), lambda i: (0, 0)),
        ],
        out_specs=pl.BlockSpec((tile, e), lambda i: (i, 0)),
        out_shape=jax.ShapeDtypeStruct((n, e), jnp.float32),
        compiler_params=pltpu.CompilerParams(
            dimension_semantics=("parallel",),
            vmem_limit_bytes=_vmem_limit(block_bytes)),
        cost_estimate=pl.CostEstimate(
            flops=2 * n * c * e + 3 * n * c, transcendentals=0,
            bytes_accessed=4 * (n * c + n * e + 2 * c + e) + 2 * c * e),
    )(yf, scale.reshape(1, c), shift.reshape(1, c),
      proj_w.astype(jnp.bfloat16), proj_b.reshape(1, e))


def embedding_stem_forward(x_nchw, stem_params, proj_w, proj_b):
    """EmbeddingStem forward (conv_stem, conv_stem_original variant).

    x_nchw: (B, C, H, W) float32 (PyTorch layout).
    stem_params: list of (w (3,3,Cin,Cout), gamma (Cout,), beta (Cout,)).
                 stride = 2 if Cin != Cout else 1, exactly as in the module.
    proj_w: (C_last, E), proj_b: (E,)  -- the final 1x1 conv.
    Returns (B, H'*W', E) == x.flatten(2).transpose(1, 2) of the NCHW result.
    """
    x = jnp.transpose(x_nchw, (0, 2, 3, 1)).astype(jnp.float32)  # NCHW -> NHWC
    bsz = x.shape[0]

    scale = jnp.ones((x.shape[-1],), jnp.float32)    # identity affine, layer 0
    shift = jnp.zeros((x.shape[-1],), jnp.float32)
    apply_affine_relu = False
    y = ho = wo = cout = None
    for w, gamma, beta in stem_params:
        cout = w.shape[3]
        y, ssum, ssq, ho, wo = _conv3x3_layer(
            x, scale, shift, w, apply_affine_relu=apply_affine_relu)

        # Fold training-mode BatchNorm (biased variance over B*Ho*Wo) into one
        # per-channel scale/shift on tiny (Cout,) tensors.
        # TODO(synk): single-pass E[y^2]-E[y]^2 can cancel when |mean| >> std;
        # switch to a shifted / two-pass variance if that regime shows up.
        n = bsz * ho * wo
        mean = jnp.sum(ssum[:, 0, :], axis=0) / n
        var = jnp.maximum(jnp.sum(ssq[:, 0, :], axis=0) / n - mean * mean, 0.0)
        scale = gamma * lax.rsqrt(var + BN_EPS)
        shift = beta - mean * scale
        apply_affine_relu = True
        x = y.reshape(bsz, ho, wo, cout)     # free reshape; fed to next conv

    # Last layer: normalize + ReLU fused with the final 1x1 projection.
    yf = y.reshape(bsz * ho * wo, cout)
    zf = _bn_relu_proj(yf, scale, shift, proj_w, proj_b)
    return zf.reshape(bsz, ho * wo, proj_w.shape[1])


# --------------------------- pure-JAX reference ------------------------------

def _reference_forward(x_nchw, stem_params, proj_w, proj_b):
    x = jnp.transpose(x_nchw, (0, 2, 3, 1)).astype(jnp.float32)
    for w, gamma, beta in stem_params:
        stride = 2 if w.shape[2] != w.shape[3] else 1
        y = lax.conv_general_dilated(
            x, w, window_strides=(stride, stride), padding=((1, 1), (1, 1)),
            dimension_numbers=("NHWC", "HWIO", "NHWC"),
            precision=lax.Precision.HIGHEST)
        mean = jnp.mean(y, axis=(0, 1, 2))
        var = jnp.mean(jnp.square(y - mean), axis=(0, 1, 2))
        x = jnp.maximum((y - mean) * lax.rsqrt(var + BN_EPS) * gamma + beta,
                        0.0)
    b, ho, wo, _ = x.shape
    y = jnp.einsum("bhwc,ce->bhwe", x, proj_w,
                   precision=lax.Precision.HIGHEST) + proj_b
    return y.reshape(b, ho * wo, -1)


# --------------------------------- main --------------------------------------

if __name__ == "__main__":
    # Small-shape instantiation consistent with the module:
    # image_size=16, channels=4, hidden_dims=[8, 16], embedding_dim=32,
    # conv_stem=True, conv_stem_original=True, cls_head=False.
    B, C_IN, IMG = 2, 4, 16
    HIDDEN = [8, 16]
    EMBED = 32

    key = jax.random.PRNGKey(0)
    k_x, k_w1, k_w2, k_g1, k_g2, k_pw, k_pb = jax.random.split(key, 7)

    x = jax.random.normal(k_x, (B, C_IN, IMG, IMG), dtype=jnp.float32)

    # Conv stem layers (kernel 3x3, pad 1, no bias); stride = 2 if Cin != Cout.
    chans = [C_IN] + HIDDEN
    w_keys = [k_w1, k_w2]
    g_keys = [k_g1, k_g2]
    stem_params = []
    for i, (cin, cout) in enumerate(zip(chans[:-1], chans[1:])):
        w = 0.1 * jax.random.normal(w_keys[i], (3, 3, cin, cout),
                                    dtype=jnp.float32)
        gamma = 1.0 + 0.05 * jax.random.normal(g_keys[i], (cout,),
                                               dtype=jnp.float32)
        beta = 0.05 * jax.random.normal(
            jax.random.fold_in(g_keys[i], 1), (cout,), dtype=jnp.float32)
        stem_params.append((w, gamma, beta))

    # Final 1x1 conv (with bias): hidden_dims[-1] -> embedding_dim.
    proj_w = 0.1 * jax.random.normal(k_pw, (HIDDEN[-1], EMBED),
                                     dtype=jnp.float32)
    proj_b = 0.05 * jax.random.normal(k_pb, (EMBED,), dtype=jnp.float32)

    fwd = jax.jit(embedding_stem_forward)
    out = jax.block_until_ready(fwd(x, stem_params, proj_w, proj_b))

    # 16 -> (stride 2) 8 -> (stride 2) 4  =>  num_patches = 4*4 = 16
    assert out.shape == (B, 16, EMBED), out.shape
    assert bool(jnp.all(jnp.isfinite(out)))

    ref = _reference_forward(x, stem_params, proj_w, proj_b)
    max_err = float(jnp.max(jnp.abs(out - ref)))
    assert max_err < 5e-2, f"max |pallas - reference| = {max_err}"

    print("KERNEL_OK")
</pallas_src>

<mosaic_0001>
module attributes {stable_mosaic.version = 11 : i64} {
  func.func @_conv3x3_stats_kernel(%arg0: i32, %arg1: memref<1x16x16x4xf32, #tpu.memory_space<vmem>>, %arg2: memref<1x4xf32, #tpu.memory_space<vmem>>, %arg3: memref<1x4xf32, #tpu.memory_space<vmem>>, %arg4: memref<3x3x4x8xbf16, #tpu.memory_space<vmem>>, %arg5: memref<1x64x8xf32, #tpu.memory_space<vmem>>, %arg6: memref<1x1x8xf32, #tpu.memory_space<vmem>>, %arg7: memref<1x1x8xf32, #tpu.memory_space<vmem>>, %arg8: memref<18x18x4xf32, #tpu.memory_space<vmem>>) attributes {dimension_semantics = [#tpu.dimension_semantics<parallel>], iteration_bounds = array<i64: 2>, scalar_prefetch = 0 : i64, scratch_operands = 1 : i64, tpu.core_type = #tpu.core_type<tc>, window_params = [{transform_indices = @transform_0, window_bounds = array<i64: 1, 16, 16, 4>}, {pipeline_mode = #tpu.pipeline_mode<synchronous>, transform_indices = @transform_1, window_bounds = array<i64: 1, 4>}, {pipeline_mode = #tpu.pipeline_mode<synchronous>, transform_indices = @transform_2, window_bounds = array<i64: 1, 4>}, {pipeline_mode = #tpu.pipeline_mode<synchronous>, transform_indices = @transform_3, window_bounds = array<i64: 3, 3, 4, 8>}, {transform_indices = @transform_4, window_bounds = array<i64: 1, 64, 8>}, {transform_indices = @transform_5, window_bounds = array<i64: 1, 1, 8>}, {transform_indices = @transform_6, window_bounds = array<i64: 1, 1, 8>}]} {
    %c0 = arith.constant 0 : index
    %c0_0 = arith.constant 0 : index
    %c0_1 = arith.constant 0 : index
    %c0_2 = arith.constant 0 : index
    %0 = vector.load %arg1[%c0, %c0_0, %c0_1, %c0_2] : memref<1x16x16x4xf32, #tpu.memory_space<vmem>>, vector<1x16x16x4xf32>
    %1 = vector.shape_cast %0 : vector<1x16x16x4xf32> to vector<16x16x4xf32>
    %cst = arith.constant 0.000000e+00 : f32
    %2 = vector.broadcast %cst : f32 to vector<18x18x4xf32>
    %c0_3 = arith.constant 0 : index
    %c0_4 = arith.constant 0 : index
    %c0_5 = arith.constant 0 : index
    %3 = vector.load %arg8[%c0_3, %c0_4, %c0_5] : memref<18x18x4xf32, #tpu.memory_space<vmem>>, vector<18x18x4xf32>
    tpu.vector_store %arg8[%c0_3, %c0_4, %c0_5], %2 {strides = array<i32>} : memref<18x18x4xf32, #tpu.memory_space<vmem>>, vector<18x18x4xf32>,
    %c1 = arith.constant 1 : index
    %c1_6 = arith.constant 1 : index
    %c0_7 = arith.constant 0 : index
    %4 = vector.load %arg8[%c1, %c1_6, %c0_7] : memref<18x18x4xf32, #tpu.memory_space<vmem>>, vector<16x16x4xf32>
    tpu.vector_store %arg8[%c1, %c1_6, %c0_7], %1 {strides = array<i32>} : memref<18x18x4xf32, #tpu.memory_space<vmem>>, vector<16x16x4xf32>,
    %cst_8 = arith.constant 0.000000e+00 : f32
    %5 = vector.broadcast %cst_8 : f32 to vector<64x8xf32>
    %c0_9 = arith.constant 0 : index
    %c0_10 = arith.constant 0 : index
    %c0_11 = arith.constant 0 : index
    %6 = tpu.strided_load %arg8[%c0_9, %c0_10, %c0_11] {strides = array<i32: 2, 2, 1>} : memref<18x18x4xf32, #tpu.memory_space<vmem>>, vector<8x8x4xf32>
    %7 = vector.shape_cast %6 : vector<8x8x4xf32> to vector<64x4xf32>
    %8 = arith.truncf %7 : vector<64x4xf32> to vector<64x4xbf16>
    %c0_12 = arith.constant 0 : index
    %c0_13 = arith.constant 0 : index
    %c0_14 = arith.constant 0 : index
    %c0_15 = arith.constant 0 : index
    %9 = vector.load %arg4[%c0_12, %c0_13, %c0_14, %c0_15] : memref<3x3x4x8xbf16, #tpu.memory_space<vmem>>, vector<1x1x4x8xbf16>
    %10 = vector.shape_cast %9 : vector<1x1x4x8xbf16> to vector<4x8xbf16>
    %cst_16 = arith.constant dense<0.000000e+00> : vector<64x8xf32>
    %11 = tpu.matmul %8, %10, %cst_16 {dimension_numbers = #tpu.dot_dimension_numbers<[1], [0], [0], [1], [0, 0, 1, 1], [], []>} : vector<64x4xbf16>, vector<4x8xbf16>, vector<64x8xf32> -> vector<64x8xf32>
    %12 = arith.addf %5, %11 : vector<64x8xf32>
    %c0_17 = arith.constant 0 : index
    %c1_18 = arith.constant 1 : index
    %c0_19 = arith.constant 0 : index
    %13 = tpu.strided_load %arg8[%c0_17, %c1_18, %c0_19] {strides = array<i32: 2, 2, 1>} : memref<18x18x4xf32, #tpu.memory_space<vmem>>, vector<8x8x4xf32>
    %14 = vector.shape_cast %13 : vector<8x8x4xf32> to vector<64x4xf32>
    %15 = arith.truncf %14 : vector<64x4xf32> to vector<64x4xbf16>
    %c0_20 = arith.constant 0 : index
    %c1_21 = arith.constant 1 : index
    %c0_22 = arith.constant 0 : index
    %c0_23 = arith.constant 0 : index
    %16 = vector.load %arg4[%c0_20, %c1_21, %c0_22, %c0_23] : memref<3x3x4x8xbf16, #tpu.memory_space<vmem>>, vector<1x1x4x8xbf16>
    %17 = vector.shape_cast %16 : vector<1x1x4x8xbf16> to vector<4x8xbf16>
    %cst_24 = arith.constant dense<0.000000e+00> : vector<64x8xf32>
    %18 = tpu.matmul %15, %17, %cst_24 {dimension_numbers = #tpu.dot_dimension_numbers<[1], [0], [0], [1], [0, 0, 1, 1], [], []>} : vector<64x4xbf16>, vector<4x8xbf16>, vector<64x8xf32> -> vector<64x8xf32>
    %19 = arith.addf %12, %18 : vector<64x8xf32>
    %c0_25 = arith.constant 0 : index
    %c2 = arith.constant 2 : index
    %c0_26 = arith.constant 0 : index
    %20 = tpu.strided_load %arg8[%c0_25, %c2, %c0_26] {strides = array<i32: 2, 2, 1>} : memref<18x18x4xf32, #tpu.memory_space<vmem>>, vector<8x8x4xf32>
    %21 = vector.shape_cast %20 : vector<8x8x4xf32> to vector<64x4xf32>
    %22 = arith.truncf %21 : vector<64x4xf32> to vector<64x4xbf16>
    %c0_27 = arith.constant 0 : index
    %c2_28 = arith.constant 2 : index
    %c0_29 = arith.constant 0 : index
    %c0_30 = arith.constant 0 : index
    %23 = vector.load %arg4[%c0_27, %c2_28, %c0_29, %c0_30] : memref<3x3x4x8xbf16, #tpu.memory_space<vmem>>, vector<1x1x4x8xbf16>
    %24 = vector.shape_cast %23 : vector<1x1x4x8xbf16> to vector<4x8xbf16>
    %cst_31 = arith.constant dense<0.000000e+00> : vector<64x8xf32>
    %25 = tpu.matmul %22, %24, %cst_31 {dimension_numbers = #tpu.dot_dimension_numbers<[1], [0], [0], [1], [0, 0, 1, 1], [], []>} : vector<64x4xbf16>, vector<4x8xbf16>, vector<64x8xf32> -> vector<64x8xf32>
    %26 = arith.addf %19, %25 : vector<64x8xf32>
    %c1_32 = arith.constant 1 : index
    %c0_33 = arith.constant 0 : index
    %c0_34 = arith.constant 0 : index
    %27 = tpu.strided_load %arg8[%c1_32, %c0_33, %c0_34] {strides = array<i32: 2, 2, 1>} : memref<18x18x4xf32, #tpu.memory_space<vmem>>, vector<8x8x4xf32>
    %28 = vector.shape_cast %27 : vector<8x8x4xf32> to vector<64x4xf32>
    %29 = arith.truncf %28 : vector<64x4xf32> to vector<64x4xbf16>
    %c1_35 = arith.constant 1 : index
    %c0_36 = arith.constant 0 : index
    %c0_37 = arith.constant 0 : index
    %c0_38 = arith.constant 0 : index
    %30 = vector.load %arg4[%c1_35, %c0_36, %c0_37, %c0_38] : memref<3x3x4x8xbf16, #tpu.memory_space<vmem>>, vector<1x1x4x8xbf16>
    %31 = vector.shape_cast %30 : vector<1x1x4x8xbf16> to vector<4x8xbf16>
    %cst_39 = arith.constant dense<0.000000e+00> : vector<64x8xf32>
    %32 = tpu.matmul %29, %31, %cst_39 {dimension_numbers = #tpu.dot_dimension_numbers<[1], [0], [0], [1], [0, 0, 1, 1], [], []>} : vector<64x4xbf16>, vector<4x8xbf16>, vector<64x8xf32> -> vector<64x8xf32>
    %33 = arith.addf %26, %32 : vector<64x8xf32>
    %c1_40 = arith.constant 1 : index
    %c1_41 = arith.constant 1 : index
    %c0_42 = arith.constant 0 : index
    %34 = tpu.strided_load %arg8[%c1_40, %c1_41, %c0_42] {strides = array<i32: 2, 2, 1>} : memref<18x18x4xf32, #tpu.memory_space<vmem>>, vector<8x8x4xf32>
    %35 = vector.shape_cast %34 : vector<8x8x4xf32> to vector<64x4xf32>
    %36 = arith.truncf %35 : vector<64x4xf32> to vector<64x4xbf16>
    %c1_43 = arith.constant 1 : index
    %c1_44 = arith.constant 1 : index
    %c0_45 = arith.constant 0 : index
    %c0_46 = arith.constant 0 : index
    %37 = vector.load %arg4[%c1_43, %c1_44, %c0_45, %c0_46] : memref<3x3x4x8xbf16, #tpu.memory_space<vmem>>, vector<1x1x4x8xbf16>
    %38 = vector.shape_cast %37 : vector<1x1x4x8xbf16> to vector<4x8xbf16>
    %cst_47 = arith.constant dense<0.000000e+00> : vector<64x8xf32>
    %39 = tpu.matmul %36, %38, %cst_47 {dimension_numbers = #tpu.dot_dimension_numbers<[1], [0], [0], [1], [0, 0, 1, 1], [], []>} : vector<64x4xbf16>, vector<4x8xbf16>, vector<64x8xf32> -> vector<64x8xf32>
    %40 = arith.addf %33, %39 : vector<64x8xf32>
    %c1_48 = arith.constant 1 : index
    %c2_49 = arith.constant 2 : index
    %c0_50 = arith.constant 0 : index
    %41 = tpu.strided_load %arg8[%c1_48, %c2_49, %c0_50] {strides = array<i32: 2, 2, 1>} : memref<18x18x4xf32, #tpu.memory_space<vmem>>, vector<8x8x4xf32>
    %42 = vector.shape_cast %41 : vector<8x8x4xf32> to vector<64x4xf32>
    %43 = arith.truncf %42 : vector<64x4xf32> to vector<64x4xbf16>
    %c1_51 = arith.constant 1 : index
    %c2_52 = arith.constant 2 : index
    %c0_53 = arith.constant 0 : index
    %c0_54 = arith.constant 0 : index
    %44 = vector.load %arg4[%c1_51, %c2_52, %c0_53, %c0_54] : memref<3x3x4x8xbf16, #tpu.memory_space<vmem>>, vector<1x1x4x8xbf16>
    %45 = vector.shape_cast %44 : vector<1x1x4x8xbf16> to vector<4x8xbf16>
    %cst_55 = arith.constant dense<0.000000e+00> : vector<64x8xf32>
    %46 = tpu.matmul %43, %45, %cst_55 {dimension_numbers = #tpu.dot_dimension_numbers<[1], [0], [0], [1], [0, 0, 1, 1], [], []>} : vector<64x4xbf16>, vector<4x8xbf16>, vector<64x8xf32> -> vector<64x8xf32>
    %47 = arith.addf %40, %46 : vector<64x8xf32>
    %c2_56 = arith.constant 2 : index
    %c0_57 = arith.constant 0 : index
    %c0_58 = arith.constant 0 : index
    %48 = tpu.strided_load %arg8[%c2_56, %c0_57, %c0_58] {strides = array<i32: 2, 2, 1>} : memref<18x18x4xf32, #tpu.memory_space<vmem>>, vector<8x8x4xf32>
    %49 = vector.shape_cast %48 : vector<8x8x4xf32> to vector<64x4xf32>
    %50 = arith.truncf %49 : vector<64x4xf32> to vector<64x4xbf16>
    %c2_59 = arith.constant 2 : index
    %c0_60 = arith.constant 0 : index
    %c0_61 = arith.constant 0 : index
    %c0_62 = arith.constant 0 : index
    %51 = vector.load %arg4[%c2_59, %c0_60, %c0_61, %c0_62] : memref<3x3x4x8xbf16, #tpu.memory_space<vmem>>, vector<1x1x4x8xbf16>
    %52 = vector.shape_cast %51 : vector<1x1x4x8xbf16> to vector<4x8xbf16>
    %cst_63 = arith.constant dense<0.000000e+00> : vector<64x8xf32>
    %53 = tpu.matmul %50, %52, %cst_63 {dimension_numbers = #tpu.dot_dimension_numbers<[1], [0], [0], [1], [0, 0, 1, 1], [], []>} : vector<64x4xbf16>, vector<4x8xbf16>, vector<64x8xf32> -> vector<64x8xf32>
    %54 = arith.addf %47, %53 : vector<64x8xf32>
    %c2_64 = arith.constant 2 : index
    %c1_65 = arith.constant 1 : index
    %c0_66 = arith.constant 0 : index
    %55 = tpu.strided_load %arg8[%c2_64, %c1_65, %c0_66] {strides = array<i32: 2, 2, 1>} : memref<18x18x4xf32, #tpu.memory_space<vmem>>, vector<8x8x4xf32>
    %56 = vector.shape_cast %55 : vector<8x8x4xf32> to vector<64x4xf32>
    %57 = arith.truncf %56 : vector<64x4xf32> to vector<64x4xbf16>
    %c2_67 = arith.constant 2 : index
    %c1_68 = arith.constant 1 : index
    %c0_69 = arith.constant 0 : index
    %c0_70 = arith.constant 0 : index
    %58 = vector.load %arg4[%c2_67, %c1_68, %c0_69, %c0_70] : memref<3x3x4x8xbf16, #tpu.memory_space<vmem>>, vector<1x1x4x8xbf16>
    %59 = vector.shape_cast %58 : vector<1x1x4x8xbf16> to vector<4x8xbf16>
    %cst_71 = arith.constant dense<0.000000e+00> : vector<64x8xf32>
    %60 = tpu.matmul %57, %59, %cst_71 {dimension_numbers = #tpu.dot_dimension_numbers<[1], [0], [0], [1], [0, 0, 1, 1], [], []>} : vector<64x4xbf16>, vector<4x8xbf16>, vector<64x8xf32> -> vector<64x8xf32>
    %61 = arith.addf %54, %60 : vector<64x8xf32>
    %c2_72 = arith.constant 2 : index
    %c2_73 = arith.constant 2 : index
    %c0_74 = arith.constant 0 : index
    %62 = tpu.strided_load %arg8[%c2_72, %c2_73, %c0_74] {strides = array<i32: 2, 2, 1>} : memref<18x18x4xf32, #tpu.memory_space<vmem>>, vector<8x8x4xf32>
    %63 = vector.shape_cast %62 : vector<8x8x4xf32> to vector<64x4xf32>
    %64 = arith.truncf %63 : vector<64x4xf32> to vector<64x4xbf16>
    %c2_75 = arith.constant 2 : index
    %c2_76 = arith.constant 2 : index
    %c0_77 = arith.constant 0 : index
    %c0_78 = arith.constant 0 : index
    %65 = vector.load %arg4[%c2_75, %c2_76, %c0_77, %c0_78] : memref<3x3x4x8xbf16, #tpu.memory_space<vmem>>, vector<1x1x4x8xbf16>
    %66 = vector.shape_cast %65 : vector<1x1x4x8xbf16> to vector<4x8xbf16>
    %cst_79 = arith.constant dense<0.000000e+00> : vector<64x8xf32>
    %67 = tpu.matmul %64, %66, %cst_79 {dimension_numbers = #tpu.dot_dimension_numbers<[1], [0], [0], [1], [0, 0, 1, 1], [], []>} : vector<64x4xbf16>, vector<4x8xbf16>, vector<64x8xf32> -> vector<64x8xf32>
    %68 = arith.addf %61, %67 : vector<64x8xf32>
    %c0_80 = arith.constant 0 : index
    %c0_81 = arith.constant 0 : index
    %c0_82 = arith.constant 0 : index
    %69 = vector.load %arg5[%c0_80, %c0_81, %c0_82] : memref<1x64x8xf32, #tpu.memory_space<vmem>>, vector<1x64x8xf32>
    %70 = vector.shape_cast %69 : vector<1x64x8xf32> to vector<64x8xf32>
    %71 = vector.shape_cast %68 : vector<64x8xf32> to vector<1x64x8xf32>
    tpu.vector_store %arg5[%c0_80, %c0_81, %c0_82], %71 {strides = array<i32>} : memref<1x64x8xf32, #tpu.memory_space<vmem>>, vector<1x64x8xf32>,
    %cst_83 = arith.constant dense<0.000000e+00> : vector<8xf32>
    %72 = vector.multi_reduction <add>, %68, %cst_83 [0] : vector<64x8xf32> to vector<8xf32>
    %73 = vector.shape_cast %72 : vector<8xf32> to vector<1x8xf32>
    %c0_84 = arith.constant 0 : index
    %c0_85 = arith.constant 0 : index
    %c0_86 = arith.constant 0 : index
    %74 = vector.load %arg6[%c0_84, %c0_85, %c0_86] : memref<1x1x8xf32, #tpu.memory_space<vmem>>, vector<1x1x8xf32>
    %75 = vector.shape_cast %74 : vector<1x1x8xf32> to vector<1x8xf32>
    %76 = vector.shape_cast %73 : vector<1x8xf32> to vector<1x1x8xf32>
    tpu.vector_store %arg6[%c0_84, %c0_85, %c0_86], %76 {strides = array<i32>} : memref<1x1x8xf32, #tpu.memory_space<vmem>>, vector<1x1x8xf32>,
    %77 = arith.mulf %68, %68 : vector<64x8xf32>
    %cst_87 = arith.constant dense<0.000000e+00> : vector<8xf32>
    %78 = vector.multi_reduction <add>, %77, %cst_87 [0] : vector<64x8xf32> to vector<8xf32>
    %79 = vector.shape_cast %78 : vector<8xf32> to vector<1x8xf32>
    %c0_88 = arith.constant 0 : index
    %c0_89 = arith.constant 0 : index
    %c0_90 = arith.constant 0 : index
    %80 = vector.load %arg7[%c0_88, %c0_89, %c0_90] : memref<1x1x8xf32, #tpu.memory_space<vmem>>, vector<1x1x8xf32>
    %81 = vector.shape_cast %80 : vector<1x1x8xf32> to vector<1x8xf32>
    %82 = vector.shape_cast %79 : vector<1x8xf32> to vector<1x1x8xf32>
    tpu.vector_store %arg7[%c0_88, %c0_89, %c0_90], %82 {strides = array<i32>} : memref<1x1x8xf32, #tpu.memory_space<vmem>>, vector<1x1x8xf32>,
    return
  }
  func.func @transform_0(%arg0: i32) -> (i32, i32, i32, i32) {
    %c0_i32 = arith.constant 0 : i32
    %c0_i32_0 = arith.constant 0 : i32
    %c0_i32_1 = arith.constant 0 : i32
    %c0_i32_2 = arith.constant 0 : i32
    return %arg0, %c0_i32, %c0_i32_0, %c0_i32_1 : i32, i32, i32, i32
  }
  func.func @transform_1(%arg0: i32) -> (i32, i32) {
    %c0_i32 = arith.constant 0 : i32
    %c0_i32_0 = arith.constant 0 : i32
    %c0_i32_1 = arith.constant 0 : i32
    return %c0_i32, %c0_i32_0 : i32, i32
  }
  func.func @transform_2(%arg0: i32) -> (i32, i32) {
    %c0_i32 = arith.constant 0 : i32
    %c0_i32_0 = arith.constant 0 : i32
    %c0_i32_1 = arith.constant 0 : i32
    return %c0_i32, %c0_i32_0 : i32, i32
  }
  func.func @transform_3(%arg0: i32) -> (i32, i32, i32, i32) {
    %c0_i32 = arith.constant 0 : i32
    %c0_i32_0 = arith.constant 0 : i32
    %c0_i32_1 = arith.constant 0 : i32
    %c0_i32_2 = arith.constant 0 : i32
    %c0_i32_3 = arith.constant 0 : i32
    return %c0_i32, %c0_i32_0, %c0_i32_1, %c0_i32_2 : i32, i32, i32, i32
  }
  func.func @transform_4(%arg0: i32) -> (i32, i32, i32) {
    %c0_i32 = arith.constant 0 : i32
    %c0_i32_0 = arith.constant 0 : i32
    %c0_i32_1 = arith.constant 0 : i32
    return %arg0, %c0_i32, %c0_i32_0 : i32, i32, i32
  }
  func.func @transform_5(%arg0: i32) -> (i32, i32, i32) {
    %c0_i32 = arith.constant 0 : i32
    %c0_i32_0 = arith.constant 0 : i32
    %c0_i32_1 = arith.constant 0 : i32
    return %arg0, %c0_i32, %c0_i32_0 : i32, i32, i32
  }
  func.func @transform_6(%arg0: i32) -> (i32, i32, i32) {
    %c0_i32 = arith.constant 0 : i32
    %c0_i32_0 = arith.constant 0 : i32
    %c0_i32_1 = arith.constant 0 : i32
    return %arg0, %c0_i32, %c0_i32_0 : i32, i32, i32
  }
}

module attributes {stable_mosaic.version = 11 : i64} {
  func.func @_conv3x3_stats_kernel(%arg0: i32, %arg1: memref<1x8x8x8xf32, #tpu.memory_space<vmem>>, %arg2: memref<1x8xf32, #tpu.memory_space<vmem>>, %arg3: memref<1x8xf32, #tpu.memory_space<vmem>>, %arg4: memref<3x3x8x16xbf16, #tpu.memory_space<vmem>>, %arg5: memref<1x16x16xf32, #tpu.memory_space<vmem>>, %arg6: memref<1x1x16xf32, #tpu.memory_space<vmem>>, %arg7: memref<1x1x16xf32, #tpu.memory_space<vmem>>, %arg8: memref<10x10x8xf32, #tpu.memory_space<vmem>>) attributes {dimension_semantics = [#tpu.dimension_semantics<parallel>], iteration_bounds = array<i64: 2>, scalar_prefetch = 0 : i64, scratch_operands = 1 : i64, tpu.core_type = #tpu.core_type<tc>, window_params = [{transform_indices = @transform_0, window_bounds = array<i64: 1, 8, 8, 8>}, {pipeline_mode = #tpu.pipeline_mode<synchronous>, transform_indices = @transform_1, window_bounds = array<i64: 1, 8>}, {pipeline_mode = #tpu.pipeline_mode<synchronous>, transform_indices = @transform_2, window_bounds = array<i64: 1, 8>}, {pipeline_mode = #tpu.pipeline_mode<synchronous>, transform_indices = @transform_3, window_bounds = array<i64: 3, 3, 8, 16>}, {transform_indices = @transform_4, window_bounds = array<i64: 1, 16, 16>}, {transform_indices = @transform_5, window_bounds = array<i64: 1, 1, 16>}, {transform_indices = @transform_6, window_bounds = array<i64: 1, 1, 16>}]} {
    %c0 = arith.constant 0 : index
    %c0_0 = arith.constant 0 : index
    %c0_1 = arith.constant 0 : index
    %c0_2 = arith.constant 0 : index
    %0 = vector.load %arg1[%c0, %c0_0, %c0_1, %c0_2] : memref<1x8x8x8xf32, #tpu.memory_space<vmem>>, vector<1x8x8x8xf32>
    %1 = vector.shape_cast %0 : vector<1x8x8x8xf32> to vector<8x8x8xf32>
    %c0_3 = arith.constant 0 : index
    %c0_4 = arith.constant 0 : index
    %2 = vector.load %arg2[%c0_3, %c0_4] : memref<1x8xf32, #tpu.memory_space<vmem>>, vector<1x8xf32>
    %3 = vector.shape_cast %2 : vector<1x8xf32> to vector<8xf32>
    %4 = vector.shape_cast %3 : vector<8xf32> to vector<1x1x8xf32>
    %5 = vector.broadcast %4 : vector<1x1x8xf32> to vector<8x8x8xf32>
    %6 = arith.mulf %1, %5 : vector<8x8x8xf32>
    %c0_5 = arith.constant 0 : index
    %c0_6 = arith.constant 0 : index
    %7 = vector.load %arg3[%c0_5, %c0_6] : memref<1x8xf32, #tpu.memory_space<vmem>>, vector<1x8xf32>
    %8 = vector.shape_cast %7 : vector<1x8xf32> to vector<8xf32>
    %9 = vector.shape_cast %8 : vector<8xf32> to vector<1x1x8xf32>
    %10 = vector.broadcast %9 : vector<1x1x8xf32> to vector<8x8x8xf32>
    %11 = arith.addf %6, %10 : vector<8x8x8xf32>
    %cst = arith.constant 0.000000e+00 : f32
    %12 = vector.broadcast %cst : f32 to vector<8x8x8xf32>
    %13 = arith.maximumf %11, %12 : vector<8x8x8xf32>
    %cst_7 = arith.constant 0.000000e+00 : f32
    %14 = vector.broadcast %cst_7 : f32 to vector<10x10x8xf32>
    %c0_8 = arith.constant 0 : index
    %c0_9 = arith.constant 0 : index
    %c0_10 = arith.constant 0 : index
    %15 = vector.load %arg8[%c0_8, %c0_9, %c0_10] : memref<10x10x8xf32, #tpu.memory_space<vmem>>, vector<10x10x8xf32>
    tpu.vector_store %arg8[%c0_8, %c0_9, %c0_10], %14 {strides = array<i32>} : memref<10x10x8xf32, #tpu.memory_space<vmem>>, vector<10x10x8xf32>,
    %c1 = arith.constant 1 : index
    %c1_11 = arith.constant 1 : index
    %c0_12 = arith.constant 0 : index
    %16 = vector.load %arg8[%c1, %c1_11, %c0_12] : memref<10x10x8xf32, #tpu.memory_space<vmem>>, vector<8x8x8xf32>
    tpu.vector_store %arg8[%c1, %c1_11, %c0_12], %13 {strides = array<i32>} : memref<10x10x8xf32, #tpu.memory_space<vmem>>, vector<8x8x8xf32>,
    %cst_13 = arith.constant 0.000000e+00 : f32
    %17 = vector.broadcast %cst_13 : f32 to vector<16x16xf32>
    %c0_14 = arith.constant 0 : index
    %c0_15 = arith.constant 0 : index
    %c0_16 = arith.constant 0 : index
    %18 = tpu.strided_load %arg8[%c0_14, %c0_15, %c0_16] {strides = array<i32: 2, 2, 1>} : memref<10x10x8xf32, #tpu.memory_space<vmem>>, vector<4x4x8xf32>
    %19 = vector.shape_cast %18 : vector<4x4x8xf32> to vector<16x8xf32>
    %20 = arith.truncf %19 : vector<16x8xf32> to vector<16x8xbf16>
    %c0_17 = arith.constant 0 : index
    %c0_18 = arith.constant 0 : index
    %c0_19 = arith.constant 0 : index
    %c0_20 = arith.constant 0 : index
    %21 = vector.load %arg4[%c0_17, %c0_18, %c0_19, %c0_20] : memref<3x3x8x16xbf16, #tpu.memory_space<vmem>>, vector<1x1x8x16xbf16>
    %22 = vector.shape_cast %21 : vector<1x1x8x16xbf16> to vector<8x16xbf16>
    %cst_21 = arith.constant dense<0.000000e+00> : vector<16x16xf32>
    %23 = tpu.matmul %20, %22, %cst_21 {dimension_numbers = #tpu.dot_dimension_numbers<[1], [0], [0], [1], [0, 0, 1, 1], [], []>} : vector<16x8xbf16>, vector<8x16xbf16>, vector<16x16xf32> -> vector<16x16xf32>
    %24 = arith.addf %17, %23 : vector<16x16xf32>
    %c0_22 = arith.constant 0 : index
    %c1_23 = arith.constant 1 : index
    %c0_24 = arith.constant 0 : index
    %25 = tpu.strided_load %arg8[%c0_22, %c1_23, %c0_24] {strides = array<i32: 2, 2, 1>} : memref<10x10x8xf32, #tpu.memory_space<vmem>>, vector<4x4x8xf32>
    %26 = vector.shape_cast %25 : vector<4x4x8xf32> to vector<16x8xf32>
    %27 = arith.truncf %26 : vector<16x8xf32> to vector<16x8xbf16>
    %c0_25 = arith.constant 0 : index
    %c1_26 = arith.constant 1 : index
    %c0_27 = arith.constant 0 : index
    %c0_28 = arith.constant 0 : index
    %28 = vector.load %arg4[%c0_25, %c1_26, %c0_27, %c0_28] : memref<3x3x8x16xbf16, #tpu.memory_space<vmem>>, vector<1x1x8x16xbf16>
    %29 = vector.shape_cast %28 : vector<1x1x8x16xbf16> to vector<8x16xbf16>
    %cst_29 = arith.constant dense<0.000000e+00> : vector<16x16xf32>
    %30 = tpu.matmul %27, %29, %cst_29 {dimension_numbers = #tpu.dot_dimension_numbers<[1], [0], [0], [1], [0, 0, 1, 1], [], []>} : vector<16x8xbf16>, vector<8x16xbf16>, vector<16x16xf32> -> vector<16x16xf32>
    %31 = arith.addf %24, %30 : vector<16x16xf32>
    %c0_30 = arith.constant 0 : index
    %c2 = arith.constant 2 : index
    %c0_31 = arith.constant 0 : index
    %32 = tpu.strided_load %arg8[%c0_30, %c2, %c0_31] {strides = array<i32: 2, 2, 1>} : memref<10x10x8xf32, #tpu.memory_space<vmem>>, vector<4x4x8xf32>
    %33 = vector.shape_cast %32 : vector<4x4x8xf32> to vector<16x8xf32>
    %34 = arith.truncf %33 : vector<16x8xf32> to vector<16x8xbf16>
    %c0_32 = arith.constant 0 : index
    %c2_33 = arith.constant 2 : index
    %c0_34 = arith.constant 0 : index
    %c0_35 = arith.constant 0 : index
    %35 = vector.load %arg4[%c0_32, %c2_33, %c0_34, %c0_35] : memref<3x3x8x16xbf16, #tpu.memory_space<vmem>>, vector<1x1x8x16xbf16>
    %36 = vector.shape_cast %35 : vector<1x1x8x16xbf16> to vector<8x16xbf16>
    %cst_36 = arith.constant dense<0.000000e+00> : vector<16x16xf32>
    %37 = tpu.matmul %34, %36, %cst_36 {dimension_numbers = #tpu.dot_dimension_numbers<[1], [0], [0], [1], [0, 0, 1, 1], [], []>} : vector<16x8xbf16>, vector<8x16xbf16>, vector<16x16xf32> -> vector<16x16xf32>
    %38 = arith.addf %31, %37 : vector<16x16xf32>
    %c1_37 = arith.constant 1 : index
    %c0_38 = arith.constant 0 : index
    %c0_39 = arith.constant 0 : index
    %39 = tpu.strided_load %arg8[%c1_37, %c0_38, %c0_39] {strides = array<i32: 2, 2, 1>} : memref<10x10x8xf32, #tpu.memory_space<vmem>>, vector<4x4x8xf32>
    %40 = vector.shape_cast %39 : vector<4x4x8xf32> to vector<16x8xf32>
    %41 = arith.truncf %40 : vector<16x8xf32> to vector<16x8xbf16>
    %c1_40 = arith.constant 1 : index
    %c0_41 = arith.constant 0 : index
    %c0_42 = arith.constant 0 : index
    %c0_43 = arith.constant 0 : index
    %42 = vector.load %arg4[%c1_40, %c0_41, %c0_42, %c0_43] : memref<3x3x8x16xbf16, #tpu.memory_space<vmem>>, vector<1x1x8x16xbf16>
    %43 = vector.shape_cast %42 : vector<1x1x8x16xbf16> to vector<8x16xbf16>
    %cst_44 = arith.constant dense<0.000000e+00> : vector<16x16xf32>
    %44 = tpu.matmul %41, %43, %cst_44 {dimension_numbers = #tpu.dot_dimension_numbers<[1], [0], [0], [1], [0, 0, 1, 1], [], []>} : vector<16x8xbf16>, vector<8x16xbf16>, vector<16x16xf32> -> vector<16x16xf32>
    %45 = arith.addf %38, %44 : vector<16x16xf32>
    %c1_45 = arith.constant 1 : index
    %c1_46 = arith.constant 1 : index
    %c0_47 = arith.constant 0 : index
    %46 = tpu.strided_load %arg8[%c1_45, %c1_46, %c0_47] {strides = array<i32: 2, 2, 1>} : memref<10x10x8xf32, #tpu.memory_space<vmem>>, vector<4x4x8xf32>
    %47 = vector.shape_cast %46 : vector<4x4x8xf32> to vector<16x8xf32>
    %48 = arith.truncf %47 : vector<16x8xf32> to vector<16x8xbf16>
    %c1_48 = arith.constant 1 : index
    %c1_49 = arith.constant 1 : index
    %c0_50 = arith.constant 0 : index
    %c0_51 = arith.constant 0 : index
    %49 = vector.load %arg4[%c1_48, %c1_49, %c0_50, %c0_51] : memref<3x3x8x16xbf16, #tpu.memory_space<vmem>>, vector<1x1x8x16xbf16>
    %50 = vector.shape_cast %49 : vector<1x1x8x16xbf16> to vector<8x16xbf16>
    %cst_52 = arith.constant dense<0.000000e+00> : vector<16x16xf32>
    %51 = tpu.matmul %48, %50, %cst_52 {dimension_numbers = #tpu.dot_dimension_numbers<[1], [0], [0], [1], [0, 0, 1, 1], [], []>} : vector<16x8xbf16>, vector<8x16xbf16>, vector<16x16xf32> -> vector<16x16xf32>
    %52 = arith.addf %45, %51 : vector<16x16xf32>
    %c1_53 = arith.constant 1 : index
    %c2_54 = arith.constant 2 : index
    %c0_55 = arith.constant 0 : index
    %53 = tpu.strided_load %arg8[%c1_53, %c2_54, %c0_55] {strides = array<i32: 2, 2, 1>} : memref<10x10x8xf32, #tpu.memory_space<vmem>>, vector<4x4x8xf32>
    %54 = vector.shape_cast %53 : vector<4x4x8xf32> to vector<16x8xf32>
    %55 = arith.truncf %54 : vector<16x8xf32> to vector<16x8xbf16>
    %c1_56 = arith.constant 1 : index
    %c2_57 = arith.constant 2 : index
    %c0_58 = arith.constant 0 : index
    %c0_59 = arith.constant 0 : index
    %56 = vector.load %arg4[%c1_56, %c2_57, %c0_58, %c0_59] : memref<3x3x8x16xbf16, #tpu.memory_space<vmem>>, vector<1x1x8x16xbf16>
    %57 = vector.shape_cast %56 : vector<1x1x8x16xbf16> to vector<8x16xbf16>
    %cst_60 = arith.constant dense<0.000000e+00> : vector<16x16xf32>
    %58 = tpu.matmul %55, %57, %cst_60 {dimension_numbers = #tpu.dot_dimension_numbers<[1], [0], [0], [1], [0, 0, 1, 1], [], []>} : vector<16x8xbf16>, vector<8x16xbf16>, vector<16x16xf32> -> vector<16x16xf32>
    %59 = arith.addf %52, %58 : vector<16x16xf32>
    %c2_61 = arith.constant 2 : index
    %c0_62 = arith.constant 0 : index
    %c0_63 = arith.constant 0 : index
    %60 = tpu.strided_load %arg8[%c2_61, %c0_62, %c0_63] {strides = array<i32: 2, 2, 1>} : memref<10x10x8xf32, #tpu.memory_space<vmem>>, vector<4x4x8xf32>
    %61 = vector.shape_cast %60 : vector<4x4x8xf32> to vector<16x8xf32>
    %62 = arith.truncf %61 : vector<16x8xf32> to vector<16x8xbf16>
    %c2_64 = arith.constant 2 : index
    %c0_65 = arith.constant 0 : index
    %c0_66 = arith.constant 0 : index
    %c0_67 = arith.constant 0 : index
    %63 = vector.load %arg4[%c2_64, %c0_65, %c0_66, %c0_67] : memref<3x3x8x16xbf16, #tpu.memory_space<vmem>>, vector<1x1x8x16xbf16>
    %64 = vector.shape_cast %63 : vector<1x1x8x16xbf16> to vector<8x16xbf16>
    %cst_68 = arith.constant dense<0.000000e+00> : vector<16x16xf32>
    %65 = tpu.matmul %62, %64, %cst_68 {dimension_numbers = #tpu.dot_dimension_numbers<[1], [0], [0], [1], [0, 0, 1, 1], [], []>} : vector<16x8xbf16>, vector<8x16xbf16>, vector<16x16xf32> -> vector<16x16xf32>
    %66 = arith.addf %59, %65 : vector<16x16xf32>
    %c2_69 = arith.constant 2 : index
    %c1_70 = arith.constant 1 : index
    %c0_71 = arith.constant 0 : index
    %67 = tpu.strided_load %arg8[%c2_69, %c1_70, %c0_71] {strides = array<i32: 2, 2, 1>} : memref<10x10x8xf32, #tpu.memory_space<vmem>>, vector<4x4x8xf32>
    %68 = vector.shape_cast %67 : vector<4x4x8xf32> to vector<16x8xf32>
    %69 = arith.truncf %68 : vector<16x8xf32> to vector<16x8xbf16>
    %c2_72 = arith.constant 2 : index
    %c1_73 = arith.constant 1 : index
    %c0_74 = arith.constant 0 : index
    %c0_75 = arith.constant 0 : index
    %70 = vector.load %arg4[%c2_72, %c1_73, %c0_74, %c0_75] : memref<3x3x8x16xbf16, #tpu.memory_space<vmem>>, vector<1x1x8x16xbf16>
    %71 = vector.shape_cast %70 : vector<1x1x8x16xbf16> to vector<8x16xbf16>
    %cst_76 = arith.constant dense<0.000000e+00> : vector<16x16xf32>
    %72 = tpu.matmul %69, %71, %cst_76 {dimension_numbers = #tpu.dot_dimension_numbers<[1], [0], [0], [1], [0, 0, 1, 1], [], []>} : vector<16x8xbf16>, vector<8x16xbf16>, vector<16x16xf32> -> vector<16x16xf32>
    %73 = arith.addf %66, %72 : vector<16x16xf32>
    %c2_77 = arith.constant 2 : index
    %c2_78 = arith.constant 2 : index
    %c0_79 = arith.constant 0 : index
    %74 = tpu.strided_load %arg8[%c2_77, %c2_78, %c0_79] {strides = array<i32: 2, 2, 1>} : memref<10x10x8xf32, #tpu.memory_space<vmem>>, vector<4x4x8xf32>
    %75 = vector.shape_cast %74 : vector<4x4x8xf32> to vector<16x8xf32>
    %76 = arith.truncf %75 : vector<16x8xf32> to vector<16x8xbf16>
    %c2_80 = arith.constant 2 : index
    %c2_81 = arith.constant 2 : index
    %c0_82 = arith.constant 0 : index
    %c0_83 = arith.constant 0 : index
    %77 = vector.load %arg4[%c2_80, %c2_81, %c0_82, %c0_83] : memref<3x3x8x16xbf16, #tpu.memory_space<vmem>>, vector<1x1x8x16xbf16>
    %78 = vector.shape_cast %77 : vector<1x1x8x16xbf16> to vector<8x16xbf16>
    %cst_84 = arith.constant dense<0.000000e+00> : vector<16x16xf32>
    %79 = tpu.matmul %76, %78, %cst_84 {dimension_numbers = #tpu.dot_dimension_numbers<[1], [0], [0], [1], [0, 0, 1, 1], [], []>} : vector<16x8xbf16>, vector<8x16xbf16>, vector<16x16xf32> -> vector<16x16xf32>
    %80 = arith.addf %73, %79 : vector<16x16xf32>
    %c0_85 = arith.constant 0 : index
    %c0_86 = arith.constant 0 : index
    %c0_87 = arith.constant 0 : index
    %81 = vector.load %arg5[%c0_85, %c0_86, %c0_87] : memref<1x16x16xf32, #tpu.memory_space<vmem>>, vector<1x16x16xf32>
    %82 = vector.shape_cast %81 : vector<1x16x16xf32> to vector<16x16xf32>
    %83 = vector.shape_cast %80 : vector<16x16xf32> to vector<1x16x16xf32>
    tpu.vector_store %arg5[%c0_85, %c0_86, %c0_87], %83 {strides = array<i32>} : memref<1x16x16xf32, #tpu.memory_space<vmem>>, vector<1x16x16xf32>,
    %cst_88 = arith.constant dense<0.000000e+00> : vector<16xf32>
    %84 = vector.multi_reduction <add>, %80, %cst_88 [0] : vector<16x16xf32> to vector<16xf32>
    %85 = vector.shape_cast %84 : vector<16xf32> to vector<1x16xf32>
    %c0_89 = arith.constant 0 : index
    %c0_90 = arith.constant 0 : index
    %c0_91 = arith.constant 0 : index
    %86 = vector.load %arg6[%c0_89, %c0_90, %c0_91] : memref<1x1x16xf32, #tpu.memory_space<vmem>>, vector<1x1x16xf32>
    %87 = vector.shape_cast %86 : vector<1x1x16xf32> to vector<1x16xf32>
    %88 = vector.shape_cast %85 : vector<1x16xf32> to vector<1x1x16xf32>
    tpu.vector_store %arg6[%c0_89, %c0_90, %c0_91], %88 {strides = array<i32>} : memref<1x1x16xf32, #tpu.memory_space<vmem>>, vector<1x1x16xf32>,
    %89 = arith.mulf %80, %80 : vector<16x16xf32>
    %cst_92 = arith.constant dense<0.000000e+00> : vector<16xf32>
    %90 = vector.multi_reduction <add>, %89, %cst_92 [0] : vector<16x16xf32> to vector<16xf32>
    %91 = vector.shape_cast %90 : vector<16xf32> to vector<1x16xf32>
    %c0_93 = arith.constant 0 : index
    %c0_94 = arith.constant 0 : index
    %c0_95 = arith.constant 0 : index
    %92 = vector.load %arg7[%c0_93, %c0_94, %c0_95] : memref<1x1x16xf32, #tpu.memory_space<vmem>>, vector<1x1x16xf32>
    %93 = vector.shape_cast %92 : vector<1x1x16xf32> to vector<1x16xf32>
    %94 = vector.shape_cast %91 : vector<1x16xf32> to vector<1x1x16xf32>
    tpu.vector_store %arg7[%c0_93, %c0_94, %c0_95], %94 {strides = array<i32>} : memref<1x1x16xf32, #tpu.memory_space<vmem>>, vector<1x1x16xf32>,
    return
  }
  func.func @transform_0(%arg0: i32) -> (i32, i32, i32, i32) {
    %c0_i32 = arith.constant 0 : i32
    %c0_i32_0 = arith.constant 0 : i32
    %c0_i32_1 = arith.constant 0 : i32
    %c0_i32_2 = arith.constant 0 : i32
    return %arg0, %c0_i32, %c0_i32_0, %c0_i32_1 : i32, i32, i32, i32
  }
  func.func @transform_1(%arg0: i32) -> (i32, i32) {
    %c0_i32 = arith.constant 0 : i32
    %c0_i32_0 = arith.constant 0 : i32
    %c0_i32_1 = arith.constant 0 : i32
    return %c0_i32, %c0_i32_0 : i32, i32
  }
  func.func @transform_2(%arg0: i32) -> (i32, i32) {
    %c0_i32 = arith.constant 0 : i32
    %c0_i32_0 = arith.constant 0 : i32
    %c0_i32_1 = arith.constant 0 : i32
    return %c0_i32, %c0_i32_0 : i32, i32
  }
  func.func @transform_3(%arg0: i32) -> (i32, i32, i32, i32) {
    %c0_i32 = arith.constant 0 : i32
    %c0_i32_0 = arith.constant 0 : i32
    %c0_i32_1 = arith.constant 0 : i32
    %c0_i32_2 = arith.constant 0 : i32
    %c0_i32_3 = arith.constant 0 : i32
    return %c0_i32, %c0_i32_0, %c0_i32_1, %c0_i32_2 : i32, i32, i32, i32
  }
  func.func @transform_4(%arg0: i32) -> (i32, i32, i32) {
    %c0_i32 = arith.constant 0 : i32
    %c0_i32_0 = arith.constant 0 : i32
    %c0_i32_1 = arith.constant 0 : i32
    return %arg0, %c0_i32, %c0_i32_0 : i32, i32, i32
  }
  func.func @transform_5(%arg0: i32) -> (i32, i32, i32) {
    %c0_i32 = arith.constant 0 : i32
    %c0_i32_0 = arith.constant 0 : i32
    %c0_i32_1 = arith.constant 0 : i32
    return %arg0, %c0_i32, %c0_i32_0 : i32, i32, i32
  }
  func.func @transform_6(%arg0: i32) -> (i32, i32, i32) {
    %c0_i32 = arith.constant 0 : i32
    %c0_i32_0 = arith.constant 0 : i32
    %c0_i32_1 = arith.constant 0 : i32
    return %arg0, %c0_i32, %c0_i32_0 : i32, i32, i32
  }
}

module attributes {stable_mosaic.version = 11 : i64} {
  func.func @_bn_relu_proj_kernel(%arg0: i32, %arg1: memref<32x16xf32, #tpu.memory_space<vmem>>, %arg2: memref<1x16xf32, #tpu.memory_space<vmem>>, %arg3: memref<1x16xf32, #tpu.memory_space<vmem>>, %arg4: memref<16x32xbf16, #tpu.memory_space<vmem>>, %arg5: memref<1x32xf32, #tpu.memory_space<vmem>>, %arg6: memref<32x32xf32, #tpu.memory_space<vmem>>) attributes {dimension_semantics = [#tpu.dimension_semantics<parallel>], iteration_bounds = array<i64: 1>, scalar_prefetch = 0 : i64, scratch_operands = 0 : i64, tpu.core_type = #tpu.core_type<tc>, window_params = [{transform_indices = @transform_0, window_bounds = array<i64: 32, 16>}, {pipeline_mode = #tpu.pipeline_mode<synchronous>, transform_indices = @transform_1, window_bounds = array<i64: 1, 16>}, {pipeline_mode = #tpu.pipeline_mode<synchronous>, transform_indices = @transform_2, window_bounds = array<i64: 1, 16>}, {pipeline_mode = #tpu.pipeline_mode<synchronous>, transform_indices = @transform_3, window_bounds = array<i64: 16, 32>}, {pipeline_mode = #tpu.pipeline_mode<synchronous>, transform_indices = @transform_4, window_bounds = array<i64: 1, 32>}, {transform_indices = @transform_5, window_bounds = array<i64: 32, 32>}]} {
    %c0 = arith.constant 0 : index
    %c0_0 = arith.constant 0 : index
    %0 = vector.load %arg1[%c0, %c0_0] : memref<32x16xf32, #tpu.memory_space<vmem>>, vector<32x16xf32>
    %c0_1 = arith.constant 0 : index
    %c0_2 = arith.constant 0 : index
    %1 = vector.load %arg2[%c0_1, %c0_2] : memref<1x16xf32, #tpu.memory_space<vmem>>, vector<1x16xf32>
    %2 = vector.broadcast %1 : vector<1x16xf32> to vector<32x16xf32>
    %3 = arith.mulf %0, %2 : vector<32x16xf32>
    %c0_3 = arith.constant 0 : index
    %c0_4 = arith.constant 0 : index
    %4 = vector.load %arg3[%c0_3, %c0_4] : memref<1x16xf32, #tpu.memory_space<vmem>>, vector<1x16xf32>
    %5 = vector.broadcast %4 : vector<1x16xf32> to vector<32x16xf32>
    %6 = arith.addf %3, %5 : vector<32x16xf32>
    %cst = arith.constant 0.000000e+00 : f32
    %7 = vector.broadcast %cst : f32 to vector<32x16xf32>
    %8 = arith.maximumf %6, %7 : vector<32x16xf32>
    %9 = arith.truncf %8 : vector<32x16xf32> to vector<32x16xbf16>
    %c0_5 = arith.constant 0 : index
    %c0_6 = arith.constant 0 : index
    %10 = vector.load %arg4[%c0_5, %c0_6] : memref<16x32xbf16, #tpu.memory_space<vmem>>, vector<16x32xbf16>
    %cst_7 = arith.constant dense<0.000000e+00> : vector<32x32xf32>
    %11 = tpu.matmul %9, %10, %cst_7 {dimension_numbers = #tpu.dot_dimension_numbers<[1], [0], [0], [1], [0, 0, 1, 1], [], []>} : vector<32x16xbf16>, vector<16x32xbf16>, vector<32x32xf32> -> vector<32x32xf32>
    %c0_8 = arith.constant 0 : index
    %c0_9 = arith.constant 0 : index
    %12 = vector.load %arg5[%c0_8, %c0_9] : memref<1x32xf32, #tpu.memory_space<vmem>>, vector<1x32xf32>
    %13 = vector.broadcast %12 : vector<1x32xf32> to vector<32x32xf32>
    %14 = arith.addf %11, %13 : vector<32x32xf32>
    %c0_10 = arith.constant 0 : index
    %c0_11 = arith.constant 0 : index
    %15 = vector.load %arg6[%c0_10, %c0_11] : memref<32x32xf32, #tpu.memory_space<vmem>>, vector<32x32xf32>
    tpu.vector_store %arg6[%c0_10, %c0_11], %14 {strides = array<i32>} : memref<32x32xf32, #tpu.memory_space<vmem>>, vector<32x32xf32>,
    return
  }
  func.func @transform_0(%arg0: i32) -> (i32, i32) {
    %c0_i32 = arith.constant 0 : i32
    %c0_i32_0 = arith.constant 0 : i32
    return %arg0, %c0_i32 : i32, i32
  }
  func.func @transform_1(%arg0: i32) -> (i32, i32) {
    %c0_i32 = arith.constant 0 : i32
    %c0_i32_0 = arith.constant 0 : i32
    %c0_i32_1 = arith.constant 0 : i32
    return %c0_i32, %c0_i32_0 : i32, i32
  }
  func.func @transform_2(%arg0: i32) -> (i32, i32) {
    %c0_i32 = arith.constant 0 : i32
    %c0_i32_0 = arith.constant 0 : i32
    %c0_i32_1 = arith.constant 0 : i32
    return %c0_i32, %c0_i32_0 : i32, i32
  }
  func.func @transform_3(%arg0: i32) -> (i32, i32) {
    %c0_i32 = arith.constant 0 : i32
    %c0_i32_0 = arith.constant 0 : i32
    %c0_i32_1 = arith.constant 0 : i32
    return %c0_i32, %c0_i32_0 : i32, i32
  }
  func.func @transform_4(%arg0: i32) -> (i32, i32) {
    %c0_i32 = arith.constant 0 : i32
    %c0_i32_0 = arith.constant 0 : i32
    %c0_i32_1 = arith.constant 0 : i32
    return %c0_i32, %c0_i32_0 : i32, i32
  }
  func.func @transform_5(%arg0: i32) -> (i32, i32) {
    %c0_i32 = arith.constant 0 : i32
    %c0_i32_0 = arith.constant 0 : i32
    return %arg0, %c0_i32 : i32, i32
  }
}

</mosaic_0001>

<bundles_post_ra>
// kernel: embedding_stem_forward.5
= control target key start
LH: loop header
LB: loop body
LE: loop exit
PB: predicated region body
PF: predicated region fallthrough
CT: control target
= control target key end

     0   :  { %s247_s0 = inlined_call_operand.vmem [shape: f32[32,16], index: 0, kind: input, shape index: {}]   ;;  %s248_s1 = inlined_call_operand.vmem [shape: f32[1,16], index: 1, kind: input, shape index: {}]   ;;  %s249_s2 = inlined_call_operand.vmem [shape: f32[1,16], index: 2, kind: input, shape index: {}]   ;;  %s250_s3 = inlined_call_operand.vmem [shape: bf16[16,32], index: 3, kind: input, shape index: {}]   ;;  %s251_s4 = inlined_call_operand.vmem [shape: f32[1,32], index: 4, kind: input, shape index: {}]   ;;  %s252_s5 = inlined_call_operand.hbm [shape: f32[32,32], index: 5, kind: output, shape index: {}]  }
   0x1   :  { %v164_v0 = vld [vmem:[%s250_s3] sm:$0xff]   ;;  %v23_v2 = vld [vmem:[%s247_s0 + $0x8] sm:$0xff]  ;;  %v24_v7 = vld [vmem:[%s247_s0 + $0x10] sm:$0xff] }
   0x2   :  { %v22_v1 = vld [vmem:[%s247_s0] sm:$0xff]  ;;  %155 = vmatprep.subr.bf16.mxu0 %v164_v0  ;;  %v25_v8 = vld [vmem:[%s247_s0 + $0x18] sm:$0xff] }
   0x3   :  { %v146_v3 = vld [vmem:[%s248_s1] ss:$0 sm:$0xff]  ;;  %156 = vmatpush3.bf16.msra.mxu0 %v164_v0 }
   0x4   :  { %v33_v4 = vmul.f32 %v146_v3, %v22_v1  ;;  %v34_v5 = vmul.f32 %v146_v3, %v23_v2  ;;  %v147_v6 = vld [vmem:[%s249_s2] ss:$0 sm:$0xff]  ;;  %v35_v9 = vmul.f32 %v146_v3, %v24_v7  ;;  %v36_v10 = vmul.f32 %v146_v3, %v25_v8 }
   0x5   :  { %10 = vsyncpa [#allocation3], 0  ;;  %vm69_vm0 = vcmask 130048   ;;  %v148_v21 = vld [vmem:[%s251_s4] ss:$0 sm:$0xff]  ;;  %vm125_vm1 = vcmask 261120  }
   0x6   :  { %v44_v11 = vadd.f32 %v147_v6, %v33_v4  ;;  %v45_v12 = vadd.f32 %v147_v6, %v34_v5  ;;  %v46_v13 = vadd.f32 %v147_v6, %v35_v9  ;;  %v47_v14 = vadd.f32 %v147_v6, %v36_v10  ;;  %s187_s0 = smov [#allocation2]  }
   0x7   :  { %s135_s6 = sshll.u32 %s187_s0, 4  ;;  %s136_s6 = int_to_ptr.vmem [resolvable:$true] %s135_s6 }
   0x8   :  { %v48_v15 = vmax.f32 %v44_v11, 0.0  ;;  %v49_v16 = vmax.f32 %v45_v12, 0.0  ;;  %v50_v17 = vmax.f32 %v46_v13, 0.0  ;;  %v51_v18 = vmax.f32 %v47_v14, 0.0  ;;  %s165_s7 = scalar_lea.vmem %s136_s6, 512  ;;  %p170_p1 = scmp.lt.s32.totalorder %s136_s6, %s136_s6 }
   0x9   :  { %p166_p0 = scmp.ne.s32.totalorder %s136_s6, %s165_s7  ;;  %p171_p2 = scmp.lt.s32.totalorder %s165_s7, %s165_s7 }
   0xa   :  { %v52_v19 = vpack.c.bf16 %v49_v16, %v48_v15  ;;  %v53_v20 = vpack.c.bf16 %v51_v18, %v50_v17 }
   0xb   :  { %p172_p3 = por %p171_p2, %p170_p1 }
   0xc   :  { %157 = vmatprep.mubr.msk.bf16.mxu0 %vm69_vm0, %v52_v19 }
   0xd   :  { %158 = vmatmul.mubr.msk.bf16.vlgmr.msra.gmra.mxu0 %vm69_vm0, %v53_v20  ;;  %p173_p4 = pnand %p172_p3, %p166_p0 }
  0xcd   :  { %v159_v22 = vpop.f32.mrf.mxu0 }
  0xce   :  { %v119_v23 = vadd.f32 %v159_v22, %v148_v21 }
  0xcf   :  { %v110_v24 = vpop.f32.mrf.mxu0 }
  0xd0   :  { %128 = vst.msk [vmem:[#allocation2 + $0x10] sm:$0xff] %vm125_vm1, %v119_v23  ;;  %v111_v25 = vadd.f32 %v148_v21, %v110_v24 }
  0xd1   :  { %v160_v26 = vpop.f32.mrf.mxu0 }
  0xd2   :  { %126 = vst.msk [vmem:[#allocation2] sm:$0xff] %vm125_vm1, %v111_v25  ;;  %v122_v27 = vadd.f32 %v160_v26, %v148_v21 }
  0xd3   :  { %v113_v28 = vpop.f32.mrf.mxu0 }
  0xd4   :  { %129 = vst.msk [vmem:[#allocation2 + $0x18] sm:$0xff] %vm125_vm1, %v122_v27  ;;  %v114_v29 = vadd.f32 %v148_v21, %v113_v28 }
  0xd6   :  { %127 = vst.msk [vmem:[#allocation2 + $0x8] sm:$0xff] %vm125_vm1, %v114_v29 }
  0xd7   :  { %176 = shalt.err (!%p173_p4)
}
  0xd8   :  { %s188_s4 = smov 128   ;;  %s189_s8 = smov 8  }
  0xd9   :  { %141 = dma.vmem_to_hbm [thread:$0]  %s136_s6, 512, %s252_s5, [#allocation3], %s188_s4, %s188_s4, %s189_s8  }
  0xda   :  { %185 = dma.done.wait [#allocation3], 512  }
  0xdb   :  { %186 = vsyncadd [#allocation3], 4294966784 }
  0xdc   :  { %145 = vsyncpa [#allocation3], 1 }

// kernel: embedding_stem_forward.3
= control target key start
LH: loop header
LB: loop body
LE: loop exit
PB: predicated region body
PF: predicated region fallthrough
CT: control target
= control target key end

     0   :  { %s1833_s21 = smov 0   ;;  %s2134_s0 = inlined_call_operand.vmem [shape: f32[2,16,16,4], index: 0, kind: input, shape index: {}]   ;;  %s2135_s1 = inlined_call_operand.vmem [shape: f32[1,4], index: 1, kind: input, shape index: {}]   ;;  %s2136_s2 = inlined_call_operand.vmem [shape: f32[1,4], index: 2, kind: input, shape index: {}]   ;;  %s2137_s3 = inlined_call_operand.vmem [shape: bf16[3,3,4,8], index: 3, kind: input, shape index: {}]   ;;  %s2138_s4 = inlined_call_operand.vmem [shape: f32[2,64,8], index: 4, kind: output, shape index: {0}]   ;;  %s2139_s5 = inlined_call_operand.vmem [shape: f32[2,1,8], index: 5, kind: output, shape index: {1}]   ;;  %s2140_s6 = inlined_call_operand.vmem [shape: f32[2,1,8], index: 6, kind: output, shape index: {2}]  }
   0x1 LB: > { %s1576_s1 = sadd.s32 4294967295, %s1795_s21   ;;  %p1580_p0 = scmp.ge.s32.totalorder %s1795_s21, 1  ;;  %s1795_s21 = sphi %s1833_s21, %s17_s21  }
   0x2   : > { %p217_p1 = scmp.lt.s32.totalorder %s1795_s21, 3 }
   0x4   : > { %p218_p2 = pnand %p1580_p0, %p217_p1 }
   0x5   : > { %p1846_p3 = scmp.lt.s32.totalorder (!%p218_p2), %s1576_s1, 1 }
   0x6   : > { %221 = sbr.rel (%p218_p2) target bundleno = 343 (0x157), region = 36 }
   0xb   : > { %v1585_v0 = vld [vmem:[%s2137_s3 + $0x2] sm:$0x3]  ;;  %vm445_vm0 = vcmask 1041408   ;;  %vm302_vm1 = vcmask 31744   ;;  %v1797_v2 = vmov 0.0   ;;  %vm305_vm2 = vcmask 25600  }
   0xc   : > { %1771 = vmatprep.subr.msk.bf16.mxu1 %vm445_vm0, %v1585_v0  ;;  %1770 = vmatprep.subr.msk.bf16.mxu0 %vm445_vm0, %v1585_v0  ;;  %v447_v1 = vsel %vm445_vm0, %v1585_v0, 0  ;;  %303 = vst.msk [vmem:[#allocation2] sm:$0xff] %vm302_vm1, %v1797_v2  ;;  %304 = vst.msk [vmem:[#allocation2 + $0x8] sm:$0xff] %vm302_vm1, %v1797_v2  ;;  %v1890_v3 = vld [vmem:[%s2137_s3] sm:$0x3]  ;;  %s2143_s1 = smov (!%p1846_p3, %s1576_s1), 1 }
   0xd   : > { %310 = vst.msk [vmem:[#allocation2 + $0x30] sm:$0xff] %vm302_vm1, %v1797_v2  ;;  %311 = vst.msk [vmem:[#allocation2 + $0x38] sm:$0xff] %vm302_vm1, %v1797_v2  ;;  %v1895_v4 = vld [vmem:[%s2137_s3 + $0x4] sm:$0x3]  ;;  %1769 = vmatpush3.bf16.msra.mxu1 %v447_v1  ;;  %1679 = vmatpush3.bf16.msra.mxu0 %v447_v1  ;;  %s1631_s28 = sshll.u32 %s2143_s1, 8  ;;  %v527_v44 = vsel %vm445_vm0, %v1890_v3, 0  ;;  %s265_s26 = scalar_lea.vmem %s2139_s5, %s2143_s1 }
   0xe   : > { %307 = vst.msk [vmem:[#allocation2 + $0x18] sm:$0xff] %vm302_vm1, %v1797_v2  ;;  %308 = vst.msk [vmem:[#allocation2 + $0x20] sm:$0xff] %vm302_vm1, %v1797_v2  ;;  %1772 = vmatprep.subr.msk.bf16.mxu1 %vm445_vm0, %v1890_v3  ;;  %1773 = vmatprep.subr.msk.bf16.mxu0 %vm445_vm0, %v1895_v4  ;;  %s1928_s7 = scalar_lea.vmem %s2134_s0, %s1631_s28  ;;  %v629_v41 = vsel %vm445_vm0, %v1895_v4, 0  ;;  %v1599_v46 = vld [vmem:[%s2137_s3 + $0x6] sm:$0x3]  ;;  %s1632_s20 = sshll.u32 %s2143_s1, 6 }
   0xf   : > { %313 = vst.msk [vmem:[#allocation2 + $0x48] sm:$0xff] %vm302_vm1, %v1797_v2  ;;  %314 = vst.msk [vmem:[#allocation2 + $0x50] sm:$0xff] %vm302_vm1, %v1797_v2  ;;  %v272_v5 = vld [vmem:[%s1928_s7 + $0x10] sm:$0xff]  ;;  %v273_v6 = vld [vmem:[%s1928_s7 + $0x18] sm:$0xff]  ;;  %vm1363_vm3 = vcmask 64512   ;;  %s2086_s23 = scalar_lea.vmem %s2138_s4, %s1632_s20  ;;  %vm1393_vm4 = vcmask 57344   ;;  %s268_s29 = scalar_lea.vmem %s2140_s6, %s2143_s1 }
  0x10   : > { %316 = vst.msk [vmem:[#allocation2 + $0x60] sm:$0xff] %vm302_vm1, %v1797_v2  ;;  %317 = vst.msk [vmem:[#allocation2 + $0x68] sm:$0xff] %vm302_vm1, %v1797_v2  ;;  %v284_v7 = vld [vmem:[%s1928_s7 + $0x70] sm:$0xff]  ;;  %v285_v8 = vld [vmem:[%s1928_s7 + $0x78] sm:$0xff] }
  0x11   : > { %319 = vst.msk [vmem:[#allocation2 + $0x78] sm:$0xff] %vm302_vm1, %v1797_v2  ;;  %320 = vst.msk [vmem:[#allocation2 + $0x80] sm:$0xff] %vm302_vm1, %v1797_v2  ;;  %v288_v9 = vld [vmem:[%s1928_s7 + $0x90] sm:$0xff]  ;;  %v289_v10 = vld [vmem:[%s1928_s7 + $0x98] sm:$0xff] }
  0x12   : > { %322 = vst.msk [vmem:[#allocation2 + $0x90] sm:$0xff] %vm302_vm1, %v1797_v2  ;;  %323 = vst.msk [vmem:[#allocation2 + $0x98] sm:$0xff] %vm302_vm1, %v1797_v2  ;;  %v276_v11 = vld [vmem:[%s1928_s7 + $0x30] sm:$0xff]  ;;  %v277_v12 = vld [vmem:[%s1928_s7 + $0x38] sm:$0xff] }
  0x13   : > { %325 = vst.msk [vmem:[#allocation2 + $0xa8] sm:$0xff] %vm302_vm1, %v1797_v2  ;;  %326 = vst.msk [vmem:[#allocation2 + $0xb0] sm:$0xff] %vm302_vm1, %v1797_v2  ;;  %v280_v13 = vld [vmem:[%s1928_s7 + $0x50] sm:$0xff]  ;;  %v281_v14 = vld [vmem:[%s1928_s7 + $0x58] sm:$0xff] }
  0x14   : > { %328 = vst.msk [vmem:[#allocation2 + $0xc0] sm:$0xff] %vm302_vm1, %v1797_v2  ;;  %329 = vst.msk [vmem:[#allocation2 + $0xc8] sm:$0xff] %vm302_vm1, %v1797_v2  ;;  %v292_v15 = vld [vmem:[%s1928_s7 + $0xb0] sm:$0xff]  ;;  %v293_v16 = vld [vmem:[%s1928_s7 + $0xb8] sm:$0xff] }
  0x15   : > { %331 = vst.msk [vmem:[#allocation2 + $0xd8] sm:$0xff] %vm302_vm1, %v1797_v2  ;;  %332 = vst.msk [vmem:[#allocation2 + $0xe0] sm:$0xff] %vm302_vm1, %v1797_v2  ;;  %v296_v17 = vld [vmem:[%s1928_s7 + $0xd0] sm:$0xff]  ;;  %v297_v18 = vld [vmem:[%s1928_s7 + $0xd8] sm:$0xff] }
  0x16   : > { %334 = vst.msk [vmem:[#allocation2 + $0xf0] sm:$0xff] %vm302_vm1, %v1797_v2  ;;  %335 = vst.msk [vmem:[#allocation2 + $0xf8] sm:$0xff] %vm302_vm1, %v1797_v2  ;;  %v412_v19 = vld [vmem:[#allocation2 + $0x1] ss:$2 sm:$0xff]  ;;  %v391_v28 = vld [vmem:[#allocation2] ss:$2 sm:$0xff] }
  0x17   : > { %337 = vst.msk [vmem:[#allocation2 + $0x108] sm:$0xff] %vm302_vm1, %v1797_v2  ;;  %338 = vst.msk [vmem:[#allocation2 + $0x110] sm:$0xff] %vm302_vm1, %v1797_v2  ;;  %v270_v20 = vld [vmem:[%s1928_s7] sm:$0xff]  ;;  %v271_v21 = vld [vmem:[%s1928_s7 + $0x8] sm:$0xff] }
  0x18   : > { %340 = vst.msk [vmem:[#allocation2 + $0x120] sm:$0xff] %vm302_vm1, %v1797_v2  ;;  %341 = vst.msk [vmem:[#allocation2 + $0x128] sm:$0xff] %vm302_vm1, %v1797_v2  ;;  %v274_v22 = vld [vmem:[%s1928_s7 + $0x20] sm:$0xff]  ;;  %v275_v23 = vld [vmem:[%s1928_s7 + $0x28] sm:$0xff] }
  0x19   : > { %343 = vst.msk [vmem:[#allocation2 + $0x138] sm:$0xff] %vm302_vm1, %v1797_v2  ;;  %344 = vst.msk [vmem:[#allocation2 + $0x140] sm:$0xff] %vm302_vm1, %v1797_v2  ;;  %v278_v24 = vld [vmem:[%s1928_s7 + $0x40] sm:$0xff]  ;;  %v279_v25 = vld [vmem:[%s1928_s7 + $0x48] sm:$0xff] }
  0x1a   : > { %346 = vst.msk [vmem:[#allocation2 + $0x150] sm:$0xff] %vm302_vm1, %v1797_v2  ;;  %347 = vst.msk [vmem:[#allocation2 + $0x158] sm:$0xff] %vm302_vm1, %v1797_v2  ;;  %v282_v26 = vld [vmem:[%s1928_s7 + $0x60] sm:$0xff]  ;;  %v1604_v48 = vld [vmem:[%s2137_s3 + $0x8] sm:$0x3] }
  0x1b   : > { %349 = vst.msk [vmem:[#allocation2 + $0x168] sm:$0xff] %vm302_vm1, %v1797_v2  ;;  %350 = vst.msk [vmem:[#allocation2 + $0x170] sm:$0xff] %vm302_vm1, %v1797_v2  ;;  %v283_v55 = vld [vmem:[%s1928_s7 + $0x68] sm:$0xff]  ;;  %v286_v57 = vld [vmem:[%s1928_s7 + $0x80] sm:$0xff]  ;;  %v848_v3 = vsel %vm445_vm0, %v1604_v48, 0 }
  0x1c   : > { %352 = vst.msk [vmem:[#allocation2 + $0x180] sm:$0xff] %vm302_vm1, %v1797_v2  ;;  %353 = vst.msk [vmem:[#allocation2 + $0x188] sm:$0xff] %vm302_vm1, %v1797_v2  ;;  %v287_v58 = vld [vmem:[%s1928_s7 + $0x88] sm:$0xff]  ;;  %v290_v60 = vld [vmem:[%s1928_s7 + $0xa0] sm:$0xff] }
  0x1d   : > { %312 = vst.msk [vmem:[#allocation2 + $0x40] sm:$0x3] %vm305_vm2, %v1797_v2  ;;  %306 = vst.msk [vmem:[#allocation2 + $0x10] sm:$0x3] %vm305_vm2, %v1797_v2  ;;  %v291_v61 = vld [vmem:[%s1928_s7 + $0xa8] sm:$0xff]  ;;  %v294_v62 = vld [vmem:[%s1928_s7 + $0xc0] sm:$0xff] }
  0x1e   : > { %309 = vst.msk [vmem:[#allocation2 + $0x28] sm:$0x3] %vm305_vm2, %v1797_v2  ;;  %315 = vst.msk [vmem:[#allocation2 + $0x58] sm:$0x3] %vm305_vm2, %v1797_v2  ;;  %v295_v0 = vld [vmem:[%s1928_s7 + $0xc8] sm:$0xff]  ;;  %v298_v1 = vld [vmem:[%s1928_s7 + $0xe0] sm:$0xff] }
  0x1f   : > { %318 = vst.msk [vmem:[#allocation2 + $0x70] sm:$0x3] %vm305_vm2, %v1797_v2  ;;  %321 = vst.msk [vmem:[#allocation2 + $0x88] sm:$0x3] %vm305_vm2, %v1797_v2 }
  0x20   : > { %324 = vst.msk [vmem:[#allocation2 + $0xa0] sm:$0x3] %vm305_vm2, %v1797_v2  ;;  %327 = vst.msk [vmem:[#allocation2 + $0xb8] sm:$0x3] %vm305_vm2, %v1797_v2 }
  0x21   : > { %330 = vst.msk [vmem:[#allocation2 + $0xd0] sm:$0x3] %vm305_vm2, %v1797_v2  ;;  %333 = vst.msk [vmem:[#allocation2 + $0xe8] sm:$0x3] %vm305_vm2, %v1797_v2 }
  0x22   : > { %336 = vst.msk [vmem:[#allocation2 + $0x100] sm:$0x3] %vm305_vm2, %v1797_v2  ;;  %339 = vst.msk [vmem:[#allocation2 + $0x118] sm:$0x3] %vm305_vm2, %v1797_v2 }
  0x23   : > { %342 = vst.msk [vmem:[#allocation2 + $0x130] sm:$0x3] %vm305_vm2, %v1797_v2  ;;  %345 = vst.msk [vmem:[#allocation2 + $0x148] sm:$0x3] %vm305_vm2, %v1797_v2 }
  0x24   : > { %348 = vst.msk [vmem:[#allocation2 + $0x160] sm:$0x3] %vm305_vm2, %v1797_v2  ;;  %351 = vst.msk [vmem:[#allocation2 + $0x178] sm:$0x3] %vm305_vm2, %v1797_v2  ;;  %v595_v35 = vld [vmem:[#allocation2 + $0x2] ss:$2 sm:$0xff] }
  0x25   : > { %354 = vst.msk [vmem:[#allocation2 + $0x190] sm:$0x3] %vm305_vm2, %v1797_v2  ;;  %v299_v2 = vld [vmem:[%s1928_s7 + $0xe8] sm:$0xff] }
  0x26   : > { %361 = vst.msk [vmem:[#allocation2 + $0x31] sm:$0xff] %vm302_vm1, %v272_v5  ;;  %362 = vst.msk [vmem:[#allocation2 + $0x39] sm:$0xff] %vm302_vm1, %v273_v6  ;;  %v738_v5 = vsel %vm445_vm0, %v1599_v46, 0 }
  0x27   : > { %373 = vst.msk [vmem:[#allocation2 + $0xc1] sm:$0xff] %vm302_vm1, %v284_v7  ;;  %374 = vst.msk [vmem:[#allocation2 + $0xc9] sm:$0xff] %vm302_vm1, %v285_v8  ;;  %v1609_v7 = vld [vmem:[%s2137_s3 + $0xa] sm:$0x3] }
  0x28   : > { %377 = vst.msk [vmem:[#allocation2 + $0xf1] sm:$0xff] %vm302_vm1, %v288_v9  ;;  %378 = vst.msk [vmem:[#allocation2 + $0xf9] sm:$0xff] %vm302_vm1, %v289_v10  ;;  %v1614_v10 = vld [vmem:[%s2137_s3 + $0xc] sm:$0x3] }
  0x29   : > { %365 = vst.msk [vmem:[#allocation2 + $0x61] sm:$0xff] %vm302_vm1, %v276_v11  ;;  %366 = vst.msk [vmem:[#allocation2 + $0x69] sm:$0xff] %vm302_vm1, %v277_v12  ;;  %v300_v12 = vld [vmem:[%s1928_s7 + $0xf0] sm:$0xff] }
  0x2a   : > { %369 = vst.msk [vmem:[#allocation2 + $0x91] sm:$0xff] %vm302_vm1, %v280_v13  ;;  %370 = vst.msk [vmem:[#allocation2 + $0x99] sm:$0xff] %vm302_vm1, %v281_v14  ;;  %v301_v13 = vld [vmem:[%s1928_s7 + $0xf8] sm:$0xff] }
  0x2b   : > { %381 = vst.msk [vmem:[#allocation2 + $0x121] sm:$0xff] %vm302_vm1, %v292_v15  ;;  %382 = vst.msk [vmem:[#allocation2 + $0x129] sm:$0xff] %vm302_vm1, %v293_v16 }
  0x2c   : > { %385 = vst.msk [vmem:[#allocation2 + $0x151] sm:$0xff] %vm302_vm1, %v296_v17  ;;  %386 = vst.msk [vmem:[#allocation2 + $0x159] sm:$0xff] %vm302_vm1, %v297_v18 }
  0x2d   : > { %359 = vst.msk [vmem:[#allocation2 + $0x19] sm:$0xff] %vm302_vm1, %v270_v20  ;;  %360 = vst.msk [vmem:[#allocation2 + $0x21] sm:$0xff] %vm302_vm1, %v271_v21  ;;  %v414_v27 = vld [vmem:[#allocation2 + $0x31] ss:$2 sm:$0xff]  ;;  %v393_v32 = vld [vmem:[#allocation2 + $0x30] ss:$2 sm:$0xff] }
  0x2e   : > { %363 = vst.msk [vmem:[#allocation2 + $0x49] sm:$0xff] %vm302_vm1, %v274_v22  ;;  %364 = vst.msk [vmem:[#allocation2 + $0x51] sm:$0xff] %vm302_vm1, %v275_v23  ;;  %v427_v29 = vpack.c.bf16 %v414_v27, %v412_v19  ;;  %v420_v30 = vld [vmem:[#allocation2 + $0xc1] ss:$2 sm:$0xff]  ;;  %v597_v36 = vld [vmem:[#allocation2 + $0x32] ss:$2 sm:$0xff]  ;;  %v406_v42 = vpack.c.bf16 %v393_v32, %v391_v28 }
  0x2f   : > { %367 = vst.msk [vmem:[#allocation2 + $0x79] sm:$0xff] %vm302_vm1, %v278_v24  ;;  %368 = vst.msk [vmem:[#allocation2 + $0x81] sm:$0xff] %vm302_vm1, %v279_v25  ;;  %v422_v31 = vld [vmem:[#allocation2 + $0xf1] ss:$2 sm:$0xff]  ;;  %v610_v45 = vpack.c.bf16 %v597_v36, %v595_v35  ;;  %v399_v52 = vld [vmem:[#allocation2 + $0xc0] ss:$2 sm:$0xff] }
  0x30   : > { %371 = vst.msk [vmem:[#allocation2 + $0xa9] sm:$0xff] %vm302_vm1, %v282_v26  ;;  %v429_v33 = vpack.c.bf16 %v422_v31, %v420_v30  ;;  %v416_v34 = vld [vmem:[#allocation2 + $0x61] ss:$2 sm:$0xff]  ;;  %1680 = vmatprep.mubr.msk.bf16.mxu0 %vm302_vm1, %v427_v29  ;;  %v395_v47 = vld [vmem:[#allocation2 + $0x60] ss:$2 sm:$0xff]  ;;  %372 = vst.msk [vmem:[#allocation2 + $0xb1] sm:$0xff] %vm302_vm1, %v283_v55 }
  0x31   : > { %v418_v37 = vld [vmem:[#allocation2 + $0x91] ss:$2 sm:$0xff]  ;;  %v397_v49 = vld [vmem:[#allocation2 + $0x90] ss:$2 sm:$0xff]  ;;  %375 = vst.msk [vmem:[#allocation2 + $0xd9] sm:$0xff] %vm302_vm1, %v286_v57  ;;  %376 = vst.msk [vmem:[#allocation2 + $0xe1] sm:$0xff] %vm302_vm1, %v287_v58 }
  0x32   : > { %1684 = vmatprep.mubr.msk.bf16.mxu1 %vm302_vm1, %v429_v33  ;;  %v428_v38 = vpack.c.bf16 %v418_v37, %v416_v34  ;;  %v424_v39 = vld [vmem:[#allocation2 + $0x121] ss:$2 sm:$0xff]  ;;  %v599_v50 = vld [vmem:[#allocation2 + $0x62] ss:$2 sm:$0xff]  ;;  %v601_v51 = vld [vmem:[#allocation2 + $0x92] ss:$2 sm:$0xff]  ;;  %v407_v63 = vpack.c.bf16 %v397_v49, %v395_v47 }
  0x33   : > { %v426_v40 = vld [vmem:[#allocation2 + $0x151] ss:$2 sm:$0xff]  ;;  %v401_v53 = vld [vmem:[#allocation2 + $0xf0] ss:$2 sm:$0xff]  ;;  %v611_v59 = vpack.c.bf16 %v601_v51, %v599_v50  ;;  %379 = vst.msk [vmem:[#allocation2 + $0x109] sm:$0xff] %vm302_vm1, %v290_v60  ;;  %380 = vst.msk [vmem:[#allocation2 + $0x111] sm:$0xff] %vm302_vm1, %v291_v61 }
  0x34   : > { %v430_v43 = vpack.c.bf16 %v426_v40, %v424_v39  ;;  %1681 = vmatmul.mubr.msk.bf16.vlgmr.msra.gmra.mxu0 %vm302_vm1, %v428_v38  ;;  %v603_v54 = vld [vmem:[#allocation2 + $0xc2] ss:$2 sm:$0xff]  ;;  %v605_v56 = vld [vmem:[#allocation2 + $0xf2] ss:$2 sm:$0xff]  ;;  %383 = vst.msk [vmem:[#allocation2 + $0x139] sm:$0xff] %vm302_vm1, %v294_v62  ;;  %v408_v4 = vpack.c.bf16 %v401_v53, %v399_v52  ;;  %384 = vst.msk [vmem:[#allocation2 + $0x141] sm:$0xff] %vm302_vm1, %v295_v0 }
  0x35   : > { %1699 = vmatpush3.bf16.msra.mxu0 %v629_v41  ;;  %1700 = vmatprep.mubr.msk.bf16.mxu0 %vm302_vm1, %v610_v45  ;;  %387 = vst.msk [vmem:[#allocation2 + $0x169] sm:$0xff] %vm302_vm1, %v298_v1  ;;  %388 = vst.msk [vmem:[#allocation2 + $0x171] sm:$0xff] %vm302_vm1, %v299_v2  ;;  %v612_v6 = vpack.c.bf16 %v605_v56, %v603_v54  ;;  %v403_v8 = vld [vmem:[#allocation2 + $0x120] ss:$2 sm:$0xff]  ;;  %v405_v14 = vld [vmem:[#allocation2 + $0x150] ss:$2 sm:$0xff] }
  0x36   : > { %1685 = vmatmul.mubr.msk.bf16.vlgmr.msra.gmra.mxu1 %vm302_vm1, %v430_v43  ;;  %1775 = vmatprep.subr.msk.bf16.mxu0 %vm445_vm0, %v1604_v48  ;;  %v607_v9 = vld [vmem:[#allocation2 + $0x122] ss:$2 sm:$0xff]  ;;  %v609_v11 = vld [vmem:[#allocation2 + $0x152] ss:$2 sm:$0xff]  ;;  %v814_v15 = vld [vmem:[#allocation2 + $0x19] ss:$2 sm:$0xff]  ;;  %v409_v20 = vpack.c.bf16 %v405_v14, %v403_v8 }
  0x37   : > { %1689 = vmatpush3.bf16.msra.mxu1 %v527_v44  ;;  %1690 = vmatprep.mubr.msk.bf16.mxu1 %vm302_vm1, %v406_v42  ;;  %v816_v16 = vld [vmem:[#allocation2 + $0x49] ss:$2 sm:$0xff]  ;;  %389 = vst.msk [vmem:[#allocation2 + $0x181] sm:$0xff] %vm302_vm1, %v300_v12  ;;  %390 = vst.msk [vmem:[#allocation2 + $0x189] sm:$0xff] %vm302_vm1, %v301_v13  ;;  %v704_v17 = vld [vmem:[#allocation2 + $0x18] ss:$2 sm:$0xff]  ;;  %v613_v19 = vpack.c.bf16 %v609_v11, %v607_v9 }
  0x38   : > { %1774 = vmatprep.subr.msk.bf16.mxu1 %vm445_vm0, %v1599_v46  ;;  %v706_v18 = vld [vmem:[#allocation2 + $0x48] ss:$2 sm:$0xff]  ;;  %v829_v21 = vpack.c.bf16 %v816_v16, %v814_v15  ;;  %v818_v23 = vld [vmem:[#allocation2 + $0x79] ss:$2 sm:$0xff]  ;;  %v820_v24 = vld [vmem:[#allocation2 + $0xa9] ss:$2 sm:$0xff] }
  0x39   : > { %v719_v22 = vpack.c.bf16 %v706_v18, %v704_v17  ;;  %v708_v25 = vld [vmem:[#allocation2 + $0x78] ss:$2 sm:$0xff]  ;;  %v710_v26 = vld [vmem:[#allocation2 + $0xa8] ss:$2 sm:$0xff]  ;;  %v830_v29 = vpack.c.bf16 %v820_v24, %v818_v23  ;;  %v822_v30 = vld [vmem:[#allocation2 + $0xd9] ss:$2 sm:$0xff] }
  0x3a   : > { %v712_v27 = vld [vmem:[#allocation2 + $0xd8] ss:$2 sm:$0xff]  ;;  %v714_v28 = vld [vmem:[#allocation2 + $0x108] ss:$2 sm:$0xff]  ;;  %v824_v31 = vld [vmem:[#allocation2 + $0x109] ss:$2 sm:$0xff]  ;;  %v720_v32 = vpack.c.bf16 %v710_v26, %v708_v25 }
  0x3b   : > { %v1068_v33 = vsel %vm445_vm0, %v1614_v10, 0  ;;  %v721_v34 = vpack.c.bf16 %v714_v28, %v712_v27  ;;  %v958_v35 = vsel %vm445_vm0, %v1609_v7, 0  ;;  %v831_v36 = vpack.c.bf16 %v824_v31, %v822_v30  ;;  %v1619_v37 = vld [vmem:[%s2137_s3 + $0xe] sm:$0x3]  ;;  %v1624_v38 = vld [vmem:[%s2137_s3 + $0x10] sm:$0x3] }
  0x3c   : > { %1701 = vmatmul.mubr.msk.bf16.vlgmr.msra.gmra.mxu0 %vm302_vm1, %v611_v59  ;;  %v826_v39 = vld [vmem:[#allocation2 + $0x139] ss:$2 sm:$0xff]  ;;  %v828_v40 = vld [vmem:[#allocation2 + $0x169] ss:$2 sm:$0xff]  ;;  %v1034_v41 = vld [vmem:[#allocation2 + $0x30] ss:$2 sm:$0xff] }
  0x3d   : > { %1719 = vmatpush3.bf16.msra.mxu0 %v848_v3  ;;  %1704 = vmatprep.mubr.msk.bf16.mxu0 %vm302_vm1, %v612_v6  ;;  %v716_v42 = vld [vmem:[#allocation2 + $0x138] ss:$2 sm:$0xff]  ;;  %v718_v43 = vld [vmem:[#allocation2 + $0x168] ss:$2 sm:$0xff]  ;;  %v832_v47 = vpack.c.bf16 %v828_v40, %v826_v39  ;;  %v1288_v61 = vsel %vm445_vm0, %v1624_v38, 0 }
  0x3e   : > { %1691 = vmatmul.mubr.msk.bf16.vlgmr.msra.gmra.mxu1 %vm302_vm1, %v407_v63  ;;  %1777 = vmatprep.subr.msk.bf16.mxu0 %vm445_vm0, %v1614_v10  ;;  %v1036_v44 = vld [vmem:[#allocation2 + $0x60] ss:$2 sm:$0xff]  ;;  %v722_v48 = vpack.c.bf16 %v718_v43, %v716_v42  ;;  %v1038_v51 = vld [vmem:[#allocation2 + $0x90] ss:$2 sm:$0xff]  ;;  %v1178_v63 = vsel %vm445_vm0, %v1619_v37, 0 }
  0x3f   : > { %1709 = vmatpush3.bf16.msra.mxu1 %v738_v5  ;;  %1694 = vmatprep.mubr.msk.bf16.mxu1 %vm302_vm1, %v408_v4  ;;  %v924_v45 = vld [vmem:[#allocation2 + $0x1a] ss:$2 sm:$0xff]  ;;  %v926_v46 = vld [vmem:[#allocation2 + $0x4a] ss:$2 sm:$0xff]  ;;  %v1049_v49 = vpack.c.bf16 %v1036_v44, %v1034_v41  ;;  %v1146_v8 = vld [vmem:[#allocation2 + $0x61] ss:$2 sm:$0xff] }
  0x40   : > { %1776 = vmatprep.subr.msk.bf16.mxu1 %vm445_vm0, %v1609_v7  ;;  %v939_v50 = vpack.c.bf16 %v926_v46, %v924_v45  ;;  %v1040_v52 = vld [vmem:[#allocation2 + $0xc0] ss:$2 sm:$0xff]  ;;  %v1042_v58 = vld [vmem:[#allocation2 + $0xf0] ss:$2 sm:$0xff]  ;;  %v1144_v7 = vld [vmem:[#allocation2 + $0x31] ss:$2 sm:$0xff] }
  0x41   : > { %v928_v53 = vld [vmem:[#allocation2 + $0x7a] ss:$2 sm:$0xff]  ;;  %v930_v54 = vld [vmem:[#allocation2 + $0xaa] ss:$2 sm:$0xff]  ;;  %v1050_v57 = vpack.c.bf16 %v1040_v52, %v1038_v51  ;;  %v1159_v12 = vpack.c.bf16 %v1146_v8, %v1144_v7  ;;  %v1148_v13 = vld [vmem:[#allocation2 + $0x91] ss:$2 sm:$0xff] }
  0x42   : > { %v932_v55 = vld [vmem:[#allocation2 + $0xda] ss:$2 sm:$0xff]  ;;  %v934_v56 = vld [vmem:[#allocation2 + $0x10a] ss:$2 sm:$0xff]  ;;  %v940_v60 = vpack.c.bf16 %v930_v54, %v928_v53  ;;  %v1150_v16 = vld [vmem:[#allocation2 + $0xc1] ss:$2 sm:$0xff] }
  0x43   : > { %v1044_v59 = vld [vmem:[#allocation2 + $0x120] ss:$2 sm:$0xff]  ;;  %v941_v62 = vpack.c.bf16 %v934_v56, %v932_v55  ;;  %v1046_v2 = vld [vmem:[#allocation2 + $0x150] ss:$2 sm:$0xff]  ;;  %v1156_v27 = vld [vmem:[#allocation2 + $0x151] ss:$2 sm:$0xff] }
  0x44   : > { %1705 = vmatmul.mubr.msk.bf16.gmra.mxu0 %vm302_vm1, %v613_v19  ;;  %v1051_v0 = vpack.c.bf16 %v1044_v59, %v1042_v58  ;;  %v936_v1 = vld [vmem:[#allocation2 + $0x13a] ss:$2 sm:$0xff]  ;;  %v938_v4 = vld [vmem:[#allocation2 + $0x16a] ss:$2 sm:$0xff]  ;;  %v1152_v19 = vld [vmem:[#allocation2 + $0xf1] ss:$2 sm:$0xff] }
  0x45   : > { %1720 = vmatprep.mubr.msk.bf16.mxu0 %vm302_vm1, %v829_v21  ;;  %v1048_v3 = vld [vmem:[#allocation2 + $0x180] ss:$2 sm:$0xff]  ;;  %v942_v10 = vpack.c.bf16 %v938_v4, %v936_v1  ;;  %v1158_v28 = vld [vmem:[#allocation2 + $0x181] ss:$2 sm:$0xff] }
  0x46   : > { %1695 = vmatmul.mubr.msk.bf16.gmra.mxu1 %vm302_vm1, %v409_v20  ;;  %v1254_v5 = vld [vmem:[#allocation2 + $0x32] ss:$2 sm:$0xff]  ;;  %v1256_v6 = vld [vmem:[#allocation2 + $0x62] ss:$2 sm:$0xff]  ;;  %v1052_v9 = vpack.c.bf16 %v1048_v3, %v1046_v2  ;;  %v1154_v20 = vld [vmem:[#allocation2 + $0x121] ss:$2 sm:$0xff]  ;;  %v1162_v30 = vpack.c.bf16 %v1158_v28, %v1156_v27 }
  0x47   : > { %1710 = vmatprep.mubr.msk.bf16.mxu1 %vm302_vm1, %v719_v22  ;;  %v1269_v11 = vpack.c.bf16 %v1256_v6, %v1254_v5  ;;  %v1258_v14 = vld [vmem:[#allocation2 + $0x92] ss:$2 sm:$0xff]  ;;  %v1260_v15 = vld [vmem:[#allocation2 + $0xc2] ss:$2 sm:$0xff]  ;;  %v1160_v22 = vpack.c.bf16 %v1150_v16, %v1148_v13  ;;  %v1161_v24 = vpack.c.bf16 %v1154_v20, %v1152_v19 }
  0x48   : > { %v1262_v17 = vld [vmem:[#allocation2 + $0xf2] ss:$2 sm:$0xff]  ;;  %v1264_v18 = vld [vmem:[#allocation2 + $0x122] ss:$2 sm:$0xff]  ;;  %v1270_v21 = vpack.c.bf16 %v1260_v15, %v1258_v14 }
  0x49   : > { %v1271_v23 = vpack.c.bf16 %v1264_v18, %v1262_v17  ;;  %v1266_v25 = vld [vmem:[#allocation2 + $0x152] ss:$2 sm:$0xff]  ;;  %v1268_v26 = vld [vmem:[#allocation2 + $0x182] ss:$2 sm:$0xff] }
  0x4c   : > { %1721 = vmatmul.mubr.msk.bf16.vlgmr.msra.gmra.mxu0 %vm302_vm1, %v830_v29  ;;  %v1272_v29 = vpack.c.bf16 %v1268_v26, %v1266_v25 }
  0x4d   : > { %1739 = vmatpush3.bf16.msra.mxu0 %v1068_v33  ;;  %1724 = vmatprep.mubr.msk.bf16.mxu0 %vm302_vm1, %v831_v36 }
  0x4e   : > { %1711 = vmatmul.mubr.msk.bf16.vlgmr.msra.gmra.mxu1 %vm302_vm1, %v720_v32  ;;  %1779 = vmatprep.subr.msk.bf16.mxu0 %vm445_vm0, %v1624_v38 }
  0x4f   : > { %1729 = vmatpush3.bf16.msra.mxu1 %v958_v35  ;;  %1714 = vmatprep.mubr.msk.bf16.mxu1 %vm302_vm1, %v721_v34 }
  0x50   : > { %1778 = vmatprep.subr.msk.bf16.mxu1 %vm445_vm0, %v1619_v37 }
  0x54   : > { %1725 = vmatmul.mubr.msk.bf16.gmra.mxu0 %vm302_vm1, %v832_v47 }
  0x55   : > { %1740 = vmatprep.mubr.msk.bf16.mxu0 %vm302_vm1, %v1049_v49 }
  0x56   : > { %1715 = vmatmul.mubr.msk.bf16.gmra.mxu1 %vm302_vm1, %v722_v48 }
  0x57   : > { %1730 = vmatprep.mubr.msk.bf16.mxu1 %vm302_vm1, %v939_v50 }
  0x5c   : > { %1741 = vmatmul.mubr.msk.bf16.vlgmr.msra.gmra.mxu0 %vm302_vm1, %v1050_v57 }
  0x5d   : > { %1759 = vmatpush3.bf16.msra.mxu0 %v1288_v61  ;;  %1744 = vmatprep.mubr.msk.bf16.mxu0 %vm302_vm1, %v1051_v0 }
  0x5e   : > { %1731 = vmatmul.mubr.msk.bf16.vlgmr.msra.gmra.mxu1 %vm302_vm1, %v940_v60 }
  0x5f   : > { %1749 = vmatpush3.bf16.msra.mxu1 %v1178_v63  ;;  %1734 = vmatprep.mubr.msk.bf16.mxu1 %vm302_vm1, %v941_v62 }
  0x64   : > { %1745 = vmatmul.mubr.msk.bf16.gmra.mxu0 %vm302_vm1, %v1052_v9 }
  0x65   : > { %1760 = vmatprep.mubr.msk.bf16.mxu0 %vm302_vm1, %v1269_v11 }
  0x66   : > { %1735 = vmatmul.mubr.msk.bf16.gmra.mxu1 %vm302_vm1, %v942_v10 }
  0x67   : > { %1750 = vmatprep.mubr.msk.bf16.mxu1 %vm302_vm1, %v1159_v12 }
  0x6c   : > { %1761 = vmatmul.mubr.msk.bf16.vlgmr.msra.gmra.mxu0 %vm302_vm1, %v1270_v21 }
  0x6d   : > { %1764 = vmatprep.mubr.msk.bf16.mxu0 %vm302_vm1, %v1271_v23 }
  0x6e   : > { %1751 = vmatmul.mubr.msk.bf16.vlgmr.msra.gmra.mxu1 %vm302_vm1, %v1160_v22 }
  0x6f   : > { %1754 = vmatprep.mubr.msk.bf16.mxu1 %vm302_vm1, %v1161_v24 }
  0x74   : > { %1765 = vmatmul.mubr.msk.bf16.gmra.mxu0 %vm302_vm1, %v1272_v29 }
  0x76   : > { %1755 = vmatmul.mubr.msk.bf16.gmra.mxu1 %vm302_vm1, %v1162_v30 }
  0xf4   : > { %v1682_v31 = vpop.f32.mrf.mxu0 }
  0xf6   : > { %v1686_v32 = vpop.f32.mrf.mxu1  ;;  %v483_v33 = vpop.f32.mrf.mxu0 }
  0xf8   : > { %v499_v34 = vpop.f32.mrf.mxu1  ;;  %v1683_v35 = vpop.f32.mrf.mxu0 }
  0xfa   : > { %v2064_v36 = vpop.f32.mrf.mxu1  ;;  %v486_v37 = vpop.f32.mrf.mxu0 }
  0xfc   : > { %v2066_v38 = vpop.f32.mrf.mxu1  ;;  %v1702_v39 = vpop.f32.mrf.mxu0 }
  0xfe   : > { %v1692_v40 = vpop.f32.mrf.mxu1  ;;  %v665_v41 = vpop.f32.mrf.mxu0 }
  0xff   : > { %v572_v7 = vadd.f32 %v1692_v40, %v1682_v31 }
 0x100   : > { %v563_v42 = vpop.f32.mrf.mxu1  ;;  %v1703_v43 = vpop.f32.mrf.mxu0 }
 0x101   : > { %v564_v10 = vadd.f32 %v563_v42, %v483_v33  ;;  %v698_v13 = vadd.f32 %v1702_v39, %v572_v7 }
 0x102   : > { %v1693_v44 = vpop.f32.mrf.mxu1  ;;  %v668_v45 = vpop.f32.mrf.mxu0 }
 0x103   : > { %v575_v14 = vadd.f32 %v1693_v44, %v1683_v35  ;;  %v696_v17 = vadd.f32 %v665_v41, %v564_v10 }
 0x104   : > { %v566_v46 = vpop.f32.mrf.mxu1  ;;  %v1706_v47 = vpop.f32.mrf.mxu0 }
 0x105   : > { %v567_v20 = vadd.f32 %v566_v46, %v486_v37  ;;  %v699_v22 = vadd.f32 %v1703_v43, %v575_v14 }
 0x106   : > { %v1696_v48 = vpop.f32.mrf.mxu1  ;;  %v681_v49 = vpop.f32.mrf.mxu0 }
 0x107   : > { %v588_v23 = vadd.f32 %v1696_v48, %v1686_v32  ;;  %v697_v31 = vadd.f32 %v668_v45, %v567_v20 }
 0x108   : > { %v579_v50 = vpop.f32.mrf.mxu1  ;;  %v2068_v51 = vpop.f32.mrf.mxu0 }
 0x109   : > { %v580_v26 = vadd.f32 %v579_v50, %v499_v34  ;;  %v702_v39 = vadd.f32 %v1706_v47, %v588_v23 }
 0x10a   : > { %v1697_v52 = vpop.f32.mrf.mxu1  ;;  %v2070_v53 = vpop.f32.mrf.mxu0 }
 0x10b   : > { %v700_v42 = vadd.f32 %v681_v49, %v580_v26  ;;  %v591_v37 = vadd.f32 %v1697_v52, %v2064_v36 }
 0x10c   : > { %v582_v54 = vpop.f32.mrf.mxu1  ;;  %v1722_v55 = vpop.f32.mrf.mxu0 }
 0x10d   : > { %v583_v32 = vadd.f32 %v582_v54, %v2066_v38 }
 0x10e   : > { %v1712_v56 = vpop.f32.mrf.mxu1  ;;  %v884_v57 = vpop.f32.mrf.mxu0 }
 0x10f   : > { %v807_v18 = vadd.f32 %v1712_v56, %v698_v13  ;;  %v701_v49 = vadd.f32 %v2070_v53, %v583_v32 }
 0x110   : > { %v774_v58 = vpop.f32.mrf.mxu1  ;;  %v1723_v59 = vpop.f32.mrf.mxu0 }
 0x111   : > { %v805_v24 = vadd.f32 %v774_v58, %v696_v17  ;;  %v917_v28 = vadd.f32 %v1722_v55, %v807_v18  ;;  %v703_v58 = vadd.f32 %v2068_v51, %v591_v37 }
 0x112   : > { %v1713_v60 = vpop.f32.mrf.mxu1  ;;  %v887_v61 = vpop.f32.mrf.mxu0 }
 0x113   : > { %v808_v29 = vadd.f32 %v1713_v60, %v699_v22  ;;  %v915_v35 = vadd.f32 %v884_v57, %v805_v24 }
 0x114   : > { %v777_v62 = vpop.f32.mrf.mxu1  ;;  %v1726_v63 = vpop.f32.mrf.mxu0 }
 0x115   : > { %v806_v43 = vadd.f32 %v777_v62, %v697_v31  ;;  %v918_v34 = vadd.f32 %v1723_v59, %v808_v29 }
 0x116   : > { %v1716_v0 = vpop.f32.mrf.mxu1  ;;  %v900_v1 = vpop.f32.mrf.mxu0 }
 0x117   : > { %v811_v46 = vadd.f32 %v1716_v0, %v702_v39  ;;  %v916_v60 = vadd.f32 %v887_v61, %v806_v43 }
 0x118   : > { %v790_v2 = vpop.f32.mrf.mxu1  ;;  %v2072_v3 = vpop.f32.mrf.mxu0 }
 0x119   : > { %v809_v55 = vadd.f32 %v790_v2, %v700_v42  ;;  %v921_v52 = vadd.f32 %v1726_v63, %v811_v46 }
 0x11a   : > { %v1717_v4 = vpop.f32.mrf.mxu1  ;;  %v2074_v5 = vpop.f32.mrf.mxu0 }
 0x11b   : > { %v919_v62 = vadd.f32 %v900_v1, %v809_v55  ;;  %v812_v0 = vadd.f32 %v1717_v4, %v703_v58 }
 0x11c   : > { %v793_v6 = vpop.f32.mrf.mxu1  ;;  %v1742_v8 = vpop.f32.mrf.mxu0 }
 0x11d   : > { %v810_v7 = vadd.f32 %v793_v6, %v701_v49 }
 0x11e   : > { %v1732_v9 = vpop.f32.mrf.mxu1  ;;  %v1104_v11 = vpop.f32.mrf.mxu0 }
 0x11f   : > { %v1027_v40 = vadd.f32 %v1732_v9, %v917_v28 }
 0x120   : > { %v994_v12 = vpop.f32.mrf.mxu1  ;;  %v1743_v15 = vpop.f32.mrf.mxu0 }
 0x121   : > { %v1025_v48 = vadd.f32 %v994_v12, %v915_v35  ;;  %v1137_v56 = vadd.f32 %v1742_v8, %v1027_v40  ;;  %v922_v12 = vadd.f32 %v2072_v3, %v812_v0 }
 0x122   : > { %v1733_v16 = vpop.f32.mrf.mxu1  ;;  %v1107_v19 = vpop.f32.mrf.mxu0 }
 0x123   : > { %v1028_v47 = vadd.f32 %v1733_v16, %v918_v34  ;;  %v1135_v38 = vadd.f32 %v1104_v11, %v1025_v48  ;;  %v920_v16 = vadd.f32 %v2074_v5, %v810_v7 }
 0x124   : > { %v997_v21 = vpop.f32.mrf.mxu1  ;;  %v1746_v25 = vpop.f32.mrf.mxu0 }
 0x125   : > { %v1026_v2 = vadd.f32 %v997_v21, %v916_v60  ;;  %v1138_v8 = vadd.f32 %v1743_v15, %v1028_v47 }
 0x126   : > { %v1736_v27 = vpop.f32.mrf.mxu1  ;;  %v1120_v30 = vpop.f32.mrf.mxu0 }
 0x127   : > { %v1031_v53 = vadd.f32 %v1736_v27, %v921_v52  ;;  %v1136_v13 = vadd.f32 %v1107_v19, %v1026_v2 }
 0x128   : > { %v1010_v33 = vpop.f32.mrf.mxu1  ;;  %v2076_v41 = vpop.f32.mrf.mxu0 }
 0x129   : > { %v1029_v11 = vadd.f32 %v1010_v33, %v919_v62  ;;  %v1141_v15 = vadd.f32 %v1746_v25, %v1031_v53 }
 0x12a   : > { %v1737_v44 = vpop.f32.mrf.mxu1  ;;  %v1123_v50 = vpop.f32.mrf.mxu0 }
 0x12b   : > { %v1032_v20 = vadd.f32 %v1737_v44, %v922_v12  ;;  %v1139_v23 = vadd.f32 %v1120_v30, %v1029_v11 }
 0x12c   : > { %v1013_v45 = vpop.f32.mrf.mxu1  ;;  %v1762_v57 = vpop.f32.mrf.mxu0 }
 0x12d   : > { %v1030_v24 = vadd.f32 %v1013_v45, %v920_v16  ;;  %v1142_v31 = vadd.f32 %v2076_v41, %v1032_v20 }
 0x12e   : > { %v1752_v36 = vpop.f32.mrf.mxu1  ;;  %v1324_v59 = vpop.f32.mrf.mxu0 }
 0x12f   : > { %v1247_v54 = vadd.f32 %v1752_v36, %v1137_v56  ;;  %v1140_v40 = vadd.f32 %v1123_v50, %v1030_v24 }
 0x130   : > { %v1214_v51 = vpop.f32.mrf.mxu1  ;;  %v1763_v9 = vpop.f32.mrf.mxu0 }
 0x131   : > { %v1357_v61 = vadd.f32 %v1762_v57, %v1247_v54  ;;  %v1245_v63 = vadd.f32 %v1214_v51, %v1135_v38 }
 0x132   : > { %v1753_v10 = vpop.f32.mrf.mxu1  ;;  %v1327_v6 = vpop.f32.mrf.mxu0 }
 0x133   : > { %1366 = vst.msk [vmem:[%s2086_s23 + $0x10] sm:$0xff] %vm1363_vm3, %v1357_v61  ;;  %v1355_v1 = vadd.f32 %v1324_v59, %v1245_v63  ;;  %v1248_v4 = vadd.f32 %v1753_v10, %v1138_v8  ;;  %v1397_v5 = vmul.f32 %v1357_v61, %v1357_v61  ;;  %v1375_v42 = vsel %vm1363_vm3, %v1357_v61, 0.0 }
 0x134   : > { %v1217_v14 = vpop.f32.mrf.mxu1  ;;  %v1766_v18 = vpop.f32.mrf.mxu0 }
 0x135   : > { %1364 = vst.msk [vmem:[%s2086_s23] sm:$0xff] %vm1363_vm3, %v1355_v1  ;;  %v1358_v17 = vadd.f32 %v1763_v9, %v1248_v4  ;;  %v1246_v21 = vadd.f32 %v1217_v14, %v1136_v13  ;;  %v1395_v3 = vmul.f32 %v1355_v1, %v1355_v1  ;;  %v1372_v33 = vsel %vm1363_vm3, %v1355_v1, 0.0 }
 0x136   : > { %v1756_v22 = vpop.f32.mrf.mxu1  ;;  %v1340_v27 = vpop.f32.mrf.mxu0  ;;  %v1406_v55 = vsel %vm1363_vm3, %v1397_v5, 0.0 }
 0x137   : > { %1367 = vst.msk [vmem:[%s2086_s23 + $0x18] sm:$0xff] %vm1363_vm3, %v1358_v17  ;;  %v1251_v26 = vadd.f32 %v1756_v22, %v1141_v15  ;;  %v1356_v19 = vadd.f32 %v1327_v6, %v1246_v21  ;;  %v1403_v44 = vsel %vm1363_vm3, %v1395_v3, 0.0  ;;  %v1398_v41 = vmul.f32 %v1358_v17, %v1358_v17 }
 0x138   : > { %v1230_v28 = vpop.f32.mrf.mxu1  ;;  %v1767_v43 = vpop.f32.mrf.mxu0  ;;  %v1377_v50 = vsel %vm1363_vm3, %v1358_v17, 0.0 }
 0x139   : > { %v1361_v25 = vadd.f32 %v1766_v18, %v1251_v26  ;;  %v1249_v29 = vadd.f32 %v1230_v28, %v1139_v23  ;;  %1365 = vst.msk [vmem:[%s2086_s23 + $0x8] sm:$0xff] %vm1363_vm3, %v1356_v19  ;;  %v1373_v30 = vsel %vm1363_vm3, %v1356_v19, 0.0  ;;  %v1396_v39 = vmul.f32 %v1356_v19, %v1356_v19 }
 0x13a   : > { %v1757_v35 = vpop.f32.mrf.mxu1  ;;  %v1374_v37 = vadd.f32 %v1373_v30, %v1372_v33  ;;  %v1343_v36 = vpop.f32.mrf.mxu0  ;;  %v1408_v52 = vsel %vm1363_vm3, %v1398_v41, 0.0 }
 0x13b   : > { %1370 = vst.msk [vmem:[%s2086_s23 + $0x30] sm:$0xff] %vm1363_vm3, %v1361_v25  ;;  %v1359_v32 = vadd.f32 %v1340_v27, %v1249_v29  ;;  %v1404_v34 = vsel %vm1363_vm3, %v1396_v39, 0.0  ;;  %v1252_v46 = vadd.f32 %v1757_v35, %v1142_v31  ;;  %v1401_v0 = vmul.f32 %v1361_v25, %v1361_v25 }
 0x13c   : > { %v1233_v48 = vpop.f32.mrf.mxu1  ;;  %v1376_v45 = vadd.f32 %v1375_v42, %v1374_v37  ;;  %v1405_v56 = vadd.f32 %v1404_v34, %v1403_v44  ;;  %v1383_v61 = vsel %vm1363_vm3, %v1361_v25, 0.0 }
 0x13d   : > { %1368 = vst.msk [vmem:[%s2086_s23 + $0x20] sm:$0xff] %vm1363_vm3, %v1359_v32  ;;  %v1399_v47 = vmul.f32 %v1359_v32, %v1359_v32  ;;  %v1362_v57 = vadd.f32 %v1767_v43, %v1252_v46  ;;  %v1250_v58 = vadd.f32 %v1233_v48, %v1140_v40  ;;  %v1379_v38 = vsel %vm1363_vm3, %v1359_v32, 0.0 }
 0x13e   : > { %v1407_v49 = vadd.f32 %v1406_v55, %v1405_v56  ;;  %v1378_v60 = vadd.f32 %v1377_v50, %v1376_v45  ;;  %v1414_v1 = vsel %vm1363_vm3, %v1401_v0, 0.0 }
 0x13f   : > { %1371 = vst.msk [vmem:[%s2086_s23 + $0x38] sm:$0xff] %vm1363_vm3, %v1362_v57  ;;  %v1360_v54 = vadd.f32 %v1343_v36, %v1250_v58  ;;  %v1410_v7 = vsel %vm1363_vm3, %v1399_v47, 0.0  ;;  %v1402_v63 = vmul.f32 %v1362_v57, %v1362_v57  ;;  %v1385_v4 = vsel %vm1363_vm3, %v1362_v57, 0.0 }
 0x140   : > { %v1380_v59 = vadd.f32 %v1379_v38, %v1378_v60  ;;  %v1409_v62 = vadd.f32 %v1408_v52, %v1407_v49 }
 0x141   : > { %1369 = vst.msk [vmem:[%s2086_s23 + $0x28] sm:$0xff] %vm1363_vm3, %v1360_v54  ;;  %v1381_v2 = vsel %vm1363_vm3, %v1360_v54, 0.0  ;;  %v1400_v51 = vmul.f32 %v1360_v54, %v1360_v54  ;;  %v1416_v13 = vsel %vm1363_vm3, %v1402_v63, 0.0 }
 0x142   : > { %v1411_v8 = vadd.f32 %v1410_v7, %v1409_v62  ;;  %v1382_v53 = vadd.f32 %v1381_v2, %v1380_v59 }
 0x143   : > { %v1412_v9 = vsel %vm1363_vm3, %v1400_v51, 0.0 }
 0x144   : > { %v1384_v10 = vadd.f32 %v1383_v61, %v1382_v53  ;;  %v1413_v11 = vadd.f32 %v1412_v9, %v1411_v8 }
 0x146   : > { %v1386_v6 = vadd.f32 %v1385_v4, %v1384_v10  ;;  %v1415_v12 = vadd.f32 %v1414_v1, %v1413_v11 }
 0x148   : > { %v1387_v14 = vrot.slane %v1386_v6, 4  ;;  %v1417_v16 = vadd.f32 %v1416_v13, %v1415_v12 }
 0x14a   : > { %v1388_v15 = vadd.f32 %v1387_v14, %v1386_v6  ;;  %v1418_v17 = vrot.slane %v1417_v16, 4 }
 0x14c   : > { %v1389_v18 = vrot.slane %v1388_v15, 2  ;;  %v1419_v20 = vadd.f32 %v1418_v17, %v1417_v16 }
 0x14e   : > { %v1390_v21 = vadd.f32 %v1389_v18, %v1388_v15  ;;  %v1420_v22 = vrot.slane %v1419_v20, 2 }
 0x150   : > { %v1391_v23 = vrot.slane %v1390_v21, 1  ;;  %v1421_v24 = vadd.f32 %v1420_v22, %v1419_v20 }
 0x152   : > { %v1392_v26 = vadd.f32 %v1391_v23, %v1390_v21  ;;  %v1422_v27 = vrot.slane %v1421_v24, 1 }
 0x154   : > { %1394 = vst.msk [vmem:[%s265_s26] sm:$0x1] %vm1393_vm4, %v1392_v26  ;;  %v1423_v3 = vadd.f32 %v1422_v27, %v1421_v24 }
 0x156   : > { %1424 = vst.msk [vmem:[%s268_s29] sm:$0x1] %vm1393_vm4, %v1423_v3 }
 0x157 PF: > { %s17_s21 = sadd.s32 1, %s1795_s21  }
 0x158   : > { %p14_p4 = scmp.ge.s32.totalorder %s17_s21, 4  }
 0x15a   :  { %16 = sbr.rel (!%p14_p4) target bundleno = 1 (0x1), region = 169 }

// kernel: embedding_stem_forward.4
= control target key start
LH: loop header
LB: loop body
LE: loop exit
PB: predicated region body
PF: predicated region fallthrough
CT: control target
= control target key end

     0   :  { %s1265_s21 = smov 0   ;;  %s1416_s0 = inlined_call_operand.vmem [shape: f32[2,8,8,8], index: 0, kind: input, shape index: {}]   ;;  %s1417_s1 = inlined_call_operand.vmem [shape: f32[1,8], index: 1, kind: input, shape index: {}]   ;;  %s1418_s2 = inlined_call_operand.vmem [shape: f32[1,8], index: 2, kind: input, shape index: {}]   ;;  %s1419_s3 = inlined_call_operand.vmem [shape: bf16[3,3,8,16], index: 3, kind: input, shape index: {}]   ;;  %s1420_s4 = inlined_call_operand.vmem [shape: f32[2,16,16], index: 4, kind: output, shape index: {0}]   ;;  %s1421_s5 = inlined_call_operand.vmem [shape: f32[2,1,16], index: 5, kind: output, shape index: {1}]   ;;  %s1422_s6 = inlined_call_operand.vmem [shape: f32[2,1,16], index: 6, kind: output, shape index: {2}]  }
   0x1 LB: > { %s1106_s22 = sadd.s32 4294967295, %s1226_s21   ;;  %p1110_p0 = scmp.ge.s32.totalorder %s1226_s21, 1  ;;  %s1226_s21 = sphi %s1265_s21, %s17_s21  }
   0x2   : > { %p217_p1 = scmp.lt.s32.totalorder %s1226_s21, 3 }
   0x4   : > { %p218_p2 = pnand %p1110_p0, %p217_p1 }
   0x5   : > { %p253_p3 = scmp.lt.s32.totalorder (!%p218_p2), %s1106_s22, 1 }
   0x6   : > { %221 = sbr.rel (%p218_p2) target bundleno = 286 (0x11e), region = 36 }
   0xb   : > { %v1117_v0 = vld [vmem:[%s1419_s3 + $0x4] sm:$0xf]  ;;  %vm386_vm0 = vcmask 1043456   ;;  %v363_v1 = vld [vmem:[%s1419_s3] sm:$0xf]  ;;  %v1228_v2 = vmov 0.0  }
   0xc   : > { %1156 = vmatprep.subr.bf16.mxu0 %v1228_v2  ;;  %v388_v3 = vsel %vm386_vm0, %v1117_v0, 0  ;;  %1162 = vmatprep.subr.bf16.mxu1 %v1228_v2  ;;  %v435_v4 = vsel %vm386_vm0, %v363_v1, 0  ;;  %vm316_vm1 = vcmask 64512   ;;  %vm318_vm2 = vcmask 58368   ;;  %s1424_s22 = smov (!%p253_p3, %s1106_s22), 1 }
   0xd   : > { %1157 = vmatpush3.bf16.msra.mxu0 %v388_v3  ;;  %1163 = vmatpush3.bf16.msra.mxu1 %v435_v4  ;;  %vm1229_vm3 = vmmov 0   ;;  %317 = vst.msk [vmem:[#allocation2] sm:$0xff] %vm316_vm1, %v1228_v2  ;;  %322 = vst.msk [vmem:[#allocation2 + $0x20] sm:$0xff] %vm316_vm1, %v1228_v2  ;;  %s1136_s27 = sshll.u32 %s1424_s22, 6  ;;  %v1115_v5 = vld [vmem:[%s1417_s1] ss:$0 sm:$0xff]  ;;  %s265_s9 = scalar_lea.vmem %s1421_s5, %s1424_s22 }
   0xe   : > { %1158 = vmatprep.mubr.msk.bf16.mxu0 %vm1229_vm3, %v1228_v2  ;;  %1164 = vmatprep.mubr.msk.bf16.mxu1 %vm1229_vm3, %v1228_v2  ;;  %323 = vst.msk [vmem:[#allocation2 + $0x28] sm:$0x3] %vm318_vm2, %v1228_v2  ;;  %327 = vst.msk [vmem:[#allocation2 + $0x48] sm:$0x3] %vm318_vm2, %v1228_v2  ;;  %s257_s8 = scalar_lea.vmem %s1416_s0, %s1136_s27  ;;  %v1116_v6 = vld [vmem:[%s1418_s2] ss:$0 sm:$0xff]  ;;  %s268_s12 = scalar_lea.vmem %s1422_s6, %s1424_s22 }
   0xf   : > { %326 = vst.msk [vmem:[#allocation2 + $0x40] sm:$0xff] %vm316_vm1, %v1228_v2  ;;  %330 = vst.msk [vmem:[#allocation2 + $0x60] sm:$0xff] %vm316_vm1, %v1228_v2  ;;  %1168 = vmatprep.subr.bf16.mxu0 %v1228_v2  ;;  %1174 = vmatprep.subr.bf16.mxu1 %v1228_v2  ;;  %v271_v7 = vld [vmem:[%s257_s8 + $0x8] sm:$0xff]  ;;  %v273_v8 = vld [vmem:[%s257_s8 + $0x18] sm:$0xff]  ;;  %s1137_s27 = sshll.u32 %s1424_s22, 4  ;;  %vm953_vm4 = vcmask 130048  }
  0x10   : > { %331 = vst.msk [vmem:[#allocation2 + $0x68] sm:$0x3] %vm318_vm2, %v1228_v2  ;;  %319 = vst.msk [vmem:[#allocation2 + $0x8] sm:$0x3] %vm318_vm2, %v1228_v2  ;;  %v275_v9 = vld [vmem:[%s257_s8 + $0x28] sm:$0xff]  ;;  %v286_v10 = vmul.f32 %v1115_v5, %v271_v7  ;;  %v288_v11 = vmul.f32 %v1115_v5, %v273_v8  ;;  %v270_v13 = vld [vmem:[%s257_s8] sm:$0xff]  ;;  %s262_s30 = scalar_lea.vmem %s1420_s4, %s1137_s27 }
  0x11   : > { %320 = vst.msk [vmem:[#allocation2 + $0x10] sm:$0xff] %vm316_vm1, %v1228_v2  ;;  %324 = vst.msk [vmem:[#allocation2 + $0x30] sm:$0xff] %vm316_vm1, %v1228_v2  ;;  %v290_v12 = vmul.f32 %v1115_v5, %v275_v9  ;;  %v272_v14 = vld [vmem:[%s257_s8 + $0x10] sm:$0xff]  ;;  %v274_v15 = vld [vmem:[%s257_s8 + $0x20] sm:$0xff]  ;;  %v285_v17 = vmul.f32 %v1115_v5, %v270_v13  ;;  %vm965_vm5 = vcmask 122880  }
  0x12   : > { %321 = vst.msk [vmem:[#allocation2 + $0x18] sm:$0x3] %vm318_vm2, %v1228_v2  ;;  %325 = vst.msk [vmem:[#allocation2 + $0x38] sm:$0x3] %vm318_vm2, %v1228_v2  ;;  %v276_v16 = vld [vmem:[%s257_s8 + $0x30] sm:$0xff]  ;;  %v287_v18 = vmul.f32 %v1115_v5, %v272_v14  ;;  %v289_v19 = vmul.f32 %v1115_v5, %v274_v15  ;;  %v277_v20 = vld [vmem:[%s257_s8 + $0x38] sm:$0xff]  ;;  %v301_v21 = vadd.f32 %v1116_v6, %v286_v10 }
  0x13   : > { %328 = vst.msk [vmem:[#allocation2 + $0x50] sm:$0xff] %vm316_vm1, %v1228_v2  ;;  %332 = vst.msk [vmem:[#allocation2 + $0x70] sm:$0xff] %vm316_vm1, %v1228_v2  ;;  %v303_v22 = vadd.f32 %v1116_v6, %v288_v11  ;;  %v305_v23 = vadd.f32 %v1116_v6, %v290_v12  ;;  %v291_v24 = vmul.f32 %v1115_v5, %v276_v16  ;;  %v1120_v39 = vld [vmem:[%s1419_s3 + $0x8] sm:$0xf]  ;;  %v1122_v40 = vld [vmem:[%s1419_s3 + $0xc] sm:$0xf] }
  0x14   : > { %329 = vst.msk [vmem:[#allocation2 + $0x58] sm:$0x3] %vm318_vm2, %v1228_v2  ;;  %333 = vst.msk [vmem:[#allocation2 + $0x78] sm:$0x3] %vm318_vm2, %v1228_v2  ;;  %v300_v25 = vadd.f32 %v1116_v6, %v285_v17  ;;  %v302_v26 = vadd.f32 %v1116_v6, %v287_v18  ;;  %v304_v27 = vadd.f32 %v1116_v6, %v289_v19  ;;  %v309_v29 = vmax.f32 %v301_v21, 0.0 }
  0x15   : > { %334 = vst.msk [vmem:[#allocation2 + $0x80] sm:$0xff] %vm316_vm1, %v1228_v2  ;;  %v292_v28 = vmul.f32 %v1115_v5, %v277_v20  ;;  %v311_v30 = vmax.f32 %v303_v22, 0.0  ;;  %v313_v31 = vmax.f32 %v305_v23, 0.0  ;;  %v306_v32 = vadd.f32 %v1116_v6, %v291_v24  ;;  %v365_v41 = vld [vmem:[#allocation2 + $0x1] ss:$2 sm:$0xf] }
  0x16   : > { %335 = vst.msk [vmem:[#allocation2 + $0x88] sm:$0x3] %vm318_vm2, %v1228_v2  ;;  %v308_v33 = vmax.f32 %v300_v25, 0.0  ;;  %v310_v34 = vmax.f32 %v302_v26, 0.0  ;;  %v312_v35 = vmax.f32 %v304_v27, 0.0  ;;  %v501_v43 = vsel %vm386_vm0, %v1120_v39, 0 }
  0x17   : > { %v307_v36 = vadd.f32 %v1116_v6, %v292_v28  ;;  %340 = vst.msk [vmem:[#allocation2 + $0x21] sm:$0xff] %vm316_vm1, %v309_v29  ;;  %342 = vst.msk [vmem:[#allocation2 + $0x41] sm:$0xff] %vm316_vm1, %v311_v30  ;;  %v314_v37 = vmax.f32 %v306_v32, 0.0  ;;  %v347_v42 = vld [vmem:[#allocation2] ss:$2 sm:$0xf] }
  0x18   : > { %344 = vst.msk [vmem:[#allocation2 + $0x61] sm:$0xff] %vm316_vm1, %v313_v31  ;;  %339 = vst.msk [vmem:[#allocation2 + $0x11] sm:$0xff] %vm316_vm1, %v308_v33  ;;  %v568_v44 = vsel %vm386_vm0, %v1122_v40, 0  ;;  %v479_v50 = vld [vmem:[#allocation2 + $0x2] ss:$2 sm:$0xf] }
  0x19   : > { %341 = vst.msk [vmem:[#allocation2 + $0x31] sm:$0xff] %vm316_vm1, %v310_v34  ;;  %343 = vst.msk [vmem:[#allocation2 + $0x51] sm:$0xff] %vm316_vm1, %v312_v35  ;;  %v315_v38 = vmax.f32 %v307_v36, 0.0  ;;  %v1124_v58 = vld [vmem:[%s1419_s3 + $0x10] sm:$0xf] }
  0x1a   : > { %345 = vst.msk [vmem:[#allocation2 + $0x71] sm:$0xff] %vm316_vm1, %v314_v37  ;;  %v636_v7 = vsel %vm386_vm0, %v1124_v58, 0  ;;  %v1126_v8 = vld [vmem:[%s1419_s3 + $0x14] sm:$0xf]  ;;  %v1128_v20 = vld [vmem:[%s1419_s3 + $0x18] sm:$0xf] }
  0x1b   : > { %346 = vst.msk [vmem:[#allocation2 + $0x81] sm:$0xff] %vm316_vm1, %v315_v38  ;;  %v704_v19 = vsel %vm386_vm0, %v1126_v8, 0  ;;  %v772_v25 = vsel %vm386_vm0, %v1128_v20, 0  ;;  %v1130_v26 = vld [vmem:[%s1419_s3 + $0x1c] sm:$0xf] }
  0x1c   : > { %v840_v37 = vsel %vm386_vm0, %v1130_v26, 0 }
  0x1e   : > { %v367_v45 = vld [vmem:[#allocation2 + $0x21] ss:$2 sm:$0xf]  ;;  %v349_v49 = vld [vmem:[#allocation2 + $0x20] ss:$2 sm:$0xf] }
  0x1f   : > { %v369_v46 = vld [vmem:[#allocation2 + $0x41] ss:$2 sm:$0xf]  ;;  %v376_v48 = vcombine.low %v365_v41, %v367_v45  ;;  %v351_v52 = vld [vmem:[#allocation2 + $0x40] ss:$2 sm:$0xf]  ;;  %v358_v54 = vcombine.low %v347_v42, %v349_v49 }
  0x20   : > { %v371_v47 = vld [vmem:[#allocation2 + $0x61] ss:$2 sm:$0xf]  ;;  %v353_v53 = vld [vmem:[#allocation2 + $0x60] ss:$2 sm:$0xf] }
  0x21   : > { %v377_v51 = vcombine.low %v369_v46, %v371_v47  ;;  %v359_v55 = vcombine.low %v351_v52, %v353_v53  ;;  %v481_v56 = vld [vmem:[#allocation2 + $0x22] ss:$2 sm:$0xf]  ;;  %v546_v61 = vld [vmem:[#allocation2 + $0x10] ss:$2 sm:$0xf] }
  0x22   : > { %v483_v57 = vld [vmem:[#allocation2 + $0x42] ss:$2 sm:$0xf]  ;;  %v548_v63 = vld [vmem:[#allocation2 + $0x30] ss:$2 sm:$0xf]  ;;  %v490_v1 = vcombine.low %v479_v50, %v481_v56 }
  0x23   : > { %v380_v59 = vpack.c.bf16 %v377_v51, %v376_v48  ;;  %v485_v60 = vld [vmem:[#allocation2 + $0x62] ss:$2 sm:$0xf]  ;;  %v362_v62 = vpack.c.bf16 %v359_v55, %v358_v54  ;;  %v550_v0 = vld [vmem:[#allocation2 + $0x50] ss:$2 sm:$0xf]  ;;  %v557_v5 = vcombine.low %v546_v61, %v548_v63 }
  0x24   : > { %v491_v3 = vcombine.low %v483_v57, %v485_v60  ;;  %v552_v4 = vld [vmem:[#allocation2 + $0x70] ss:$2 sm:$0xf]  ;;  %v614_v9 = vld [vmem:[#allocation2 + $0x11] ss:$2 sm:$0xf] }
  0x25   : > { %1159 = vmatmul.mubr.msk.bf16.vlgmr.msra.gmra.mxu0 %vm316_vm1, %v380_v59  ;;  %1165 = vmatmul.mubr.msk.bf16.vlgmr.msra.gmra.mxu1 %vm316_vm1, %v362_v62  ;;  %v558_v6 = vcombine.low %v550_v0, %v552_v4  ;;  %v616_v10 = vld [vmem:[#allocation2 + $0x31] ss:$2 sm:$0xf]  ;;  %v682_v15 = vld [vmem:[#allocation2 + $0x12] ss:$2 sm:$0xf] }
  0x26   : > { %1169 = vmatpush3.bf16.msra.mxu0 %v501_v43  ;;  %1175 = vmatpush3.bf16.msra.mxu1 %v568_v44  ;;  %v494_v11 = vpack.c.bf16 %v491_v3, %v490_v1  ;;  %v618_v12 = vld [vmem:[#allocation2 + $0x51] ss:$2 sm:$0xf]  ;;  %v684_v16 = vld [vmem:[#allocation2 + $0x32] ss:$2 sm:$0xf]  ;;  %v625_v21 = vcombine.low %v614_v9, %v616_v10 }
  0x27   : > { %1170 = vmatprep.mubr.msk.bf16.mxu0 %vm1229_vm3, %v1228_v2  ;;  %1176 = vmatprep.mubr.msk.bf16.mxu1 %vm1229_vm3, %v1228_v2  ;;  %v620_v13 = vld [vmem:[#allocation2 + $0x71] ss:$2 sm:$0xf]  ;;  %v561_v14 = vpack.c.bf16 %v558_v6, %v557_v5  ;;  %v686_v17 = vld [vmem:[#allocation2 + $0x52] ss:$2 sm:$0xf]  ;;  %v693_v23 = vcombine.low %v682_v15, %v684_v16 }
  0x28   : > { %1180 = vmatprep.subr.bf16.mxu0 %v1228_v2  ;;  %1186 = vmatprep.subr.bf16.mxu1 %v1228_v2  ;;  %v688_v18 = vld [vmem:[#allocation2 + $0x72] ss:$2 sm:$0xf]  ;;  %v626_v22 = vcombine.low %v618_v12, %v620_v13  ;;  %v750_v27 = vld [vmem:[#allocation2 + $0x20] ss:$2 sm:$0xf] }
  0x29   : > { %v694_v24 = vcombine.low %v686_v17, %v688_v18  ;;  %v752_v28 = vld [vmem:[#allocation2 + $0x40] ss:$2 sm:$0xf]  ;;  %v818_v33 = vld [vmem:[#allocation2 + $0x21] ss:$2 sm:$0xf] }
  0x2a   : > { %v629_v29 = vpack.c.bf16 %v626_v22, %v625_v21  ;;  %v754_v30 = vld [vmem:[#allocation2 + $0x60] ss:$2 sm:$0xf]  ;;  %v820_v34 = vld [vmem:[#allocation2 + $0x41] ss:$2 sm:$0xf]  ;;  %v761_v38 = vcombine.low %v750_v27, %v752_v28 }
  0x2b   : > { %v756_v31 = vld [vmem:[#allocation2 + $0x80] ss:$2 sm:$0xf]  ;;  %v697_v32 = vpack.c.bf16 %v694_v24, %v693_v23  ;;  %v822_v35 = vld [vmem:[#allocation2 + $0x61] ss:$2 sm:$0xf]  ;;  %v829_v40 = vcombine.low %v818_v33, %v820_v34 }
  0x2c   : > { %v824_v36 = vld [vmem:[#allocation2 + $0x81] ss:$2 sm:$0xf]  ;;  %v762_v39 = vcombine.low %v754_v30, %v756_v31  ;;  %v886_v44 = vld [vmem:[#allocation2 + $0x22] ss:$2 sm:$0xf] }
  0x2d   : > { %1171 = vmatmul.mubr.msk.bf16.vlgmr.msra.gmra.mxu0 %vm316_vm1, %v494_v11  ;;  %1177 = vmatmul.mubr.msk.bf16.vlgmr.msra.gmra.mxu1 %vm316_vm1, %v561_v14  ;;  %v830_v41 = vcombine.low %v822_v35, %v824_v36  ;;  %v1132_v42 = vld [vmem:[%s1419_s3 + $0x20] sm:$0xf] }
  0x2e   : > { %1181 = vmatpush3.bf16.msra.mxu0 %v636_v7  ;;  %1187 = vmatpush3.bf16.msra.mxu1 %v704_v19  ;;  %v765_v43 = vpack.c.bf16 %v762_v39, %v761_v38  ;;  %v888_v45 = vld [vmem:[#allocation2 + $0x42] ss:$2 sm:$0xf]  ;;  %v908_v49 = vsel %vm386_vm0, %v1132_v42, 0 }
  0x2f   : > { %1182 = vmatprep.mubr.msk.bf16.mxu0 %vm1229_vm3, %v1228_v2  ;;  %1188 = vmatprep.mubr.msk.bf16.mxu1 %vm1229_vm3, %v1228_v2  ;;  %v833_v46 = vpack.c.bf16 %v830_v41, %v829_v40  ;;  %v890_v47 = vld [vmem:[#allocation2 + $0x62] ss:$2 sm:$0xf]  ;;  %v897_v50 = vcombine.low %v886_v44, %v888_v45 }
  0x30   : > { %1192 = vmatprep.subr.bf16.mxu0 %v1228_v2  ;;  %1198 = vmatprep.subr.bf16.mxu1 %v1228_v2  ;;  %v892_v48 = vld [vmem:[#allocation2 + $0x82] ss:$2 sm:$0xf] }
  0x31   : > { %v898_v51 = vcombine.low %v890_v47, %v892_v48 }
  0x33   : > { %v901_v52 = vpack.c.bf16 %v898_v51, %v897_v50 }
  0x35   : > { %1183 = vmatmul.mubr.msk.bf16.vlgmr.msra.gmra.mxu0 %vm316_vm1, %v629_v29  ;;  %1189 = vmatmul.mubr.msk.bf16.vlgmr.msra.gmra.mxu1 %vm316_vm1, %v697_v32 }
  0x36   : > { %1193 = vmatpush3.bf16.msra.mxu0 %v772_v25  ;;  %1199 = vmatpush3.bf16.msra.mxu1 %v840_v37 }
  0x37   : > { %1194 = vmatprep.mubr.msk.bf16.mxu0 %vm1229_vm3, %v1228_v2  ;;  %1200 = vmatprep.mubr.msk.bf16.mxu1 %vm1229_vm3, %v1228_v2 }
  0x38   : > { %1204 = vmatprep.subr.bf16.mxu0 %v1228_v2 }
  0x3d   : > { %1195 = vmatmul.mubr.msk.bf16.vlgmr.msra.gmra.mxu0 %vm316_vm1, %v765_v43  ;;  %1201 = vmatmul.mubr.msk.bf16.vlgmr.msra.gmra.mxu1 %vm316_vm1, %v833_v46 }
  0x3e   : > { %1205 = vmatpush3.bf16.msra.mxu0 %v908_v49  ;;  %1206 = vmatprep.mubr.msk.bf16.mxu0 %vm1229_vm3, %v1228_v2 }
  0x45   : > { %1207 = vmatmul.mubr.msk.bf16.vlgmr.msra.gmra.mxu0 %vm316_vm1, %v901_v52 }
  0xe5   : > { %v424_v53 = vpop.f32.mrf.mxu0  ;;  %v471_v54 = vpop.f32.mrf.mxu1 }
  0xe6   : > { %v472_v3 = vadd.f32 %v471_v54, %v424_v53 }
  0xe7   : > { %v1160_v55 = vpop.f32.mrf.mxu0  ;;  %v1166_v56 = vpop.f32.mrf.mxu1 }
  0xe9   : > { %v427_v57 = vpop.f32.mrf.mxu0  ;;  %v474_v58 = vpop.f32.mrf.mxu1 }
  0xea   : > { %v475_v8 = vadd.f32 %v474_v58, %v427_v57 }
  0xeb   : > { %v1161_v59 = vpop.f32.mrf.mxu0  ;;  %v1167_v60 = vpop.f32.mrf.mxu1 }
  0xed   : > { %v537_v61 = vpop.f32.mrf.mxu0  ;;  %v604_v62 = vpop.f32.mrf.mxu1 }
  0xee   : > { %v544_v2 = vadd.f32 %v537_v61, %v472_v3 }
  0xef   : > { %v1172_v63 = vpop.f32.mrf.mxu0  ;;  %v1178_v0 = vpop.f32.mrf.mxu1 }
  0xf0   : > { %v611_v11 = vadd.f32 %v604_v62, %v544_v2 }
  0xf1   : > { %v540_v1 = vpop.f32.mrf.mxu0  ;;  %v607_v4 = vpop.f32.mrf.mxu1 }
  0xf2   : > { %v545_v12 = vadd.f32 %v540_v1, %v475_v8 }
  0xf3   : > { %v1173_v5 = vpop.f32.mrf.mxu0  ;;  %v1179_v6 = vpop.f32.mrf.mxu1 }
  0xf4   : > { %v612_v18 = vadd.f32 %v607_v4, %v545_v12 }
  0xf5   : > { %v672_v7 = vpop.f32.mrf.mxu0  ;;  %v740_v9 = vpop.f32.mrf.mxu1 }
  0xf6   : > { %v679_v15 = vadd.f32 %v672_v7, %v611_v11 }
  0xf7   : > { %v1184_v10 = vpop.f32.mrf.mxu0  ;;  %v1190_v13 = vpop.f32.mrf.mxu1 }
  0xf8   : > { %v747_v21 = vadd.f32 %v740_v9, %v679_v15 }
  0xf9   : > { %v675_v14 = vpop.f32.mrf.mxu0  ;;  %v743_v16 = vpop.f32.mrf.mxu1 }
  0xfa   : > { %v680_v22 = vadd.f32 %v675_v14, %v612_v18 }
  0xfb   : > { %v1185_v17 = vpop.f32.mrf.mxu0  ;;  %v1191_v19 = vpop.f32.mrf.mxu1 }
  0xfc   : > { %v748_v28 = vadd.f32 %v743_v16, %v680_v22 }
  0xfd   : > { %v808_v20 = vpop.f32.mrf.mxu0  ;;  %v876_v23 = vpop.f32.mrf.mxu1 }
  0xfe   : > { %v815_v25 = vadd.f32 %v808_v20, %v747_v21 }
  0xff   : > { %v1196_v24 = vpop.f32.mrf.mxu0  ;;  %v1202_v26 = vpop.f32.mrf.mxu1 }
 0x100   : > { %v883_v31 = vadd.f32 %v876_v23, %v815_v25 }
 0x101   : > { %v811_v27 = vpop.f32.mrf.mxu0  ;;  %v879_v29 = vpop.f32.mrf.mxu1 }
 0x102   : > { %v816_v32 = vadd.f32 %v811_v27, %v748_v28 }
 0x103   : > { %v1197_v30 = vpop.f32.mrf.mxu0  ;;  %v1203_v33 = vpop.f32.mrf.mxu1 }
 0x104   : > { %v884_v37 = vadd.f32 %v879_v29, %v816_v32 }
 0x105   : > { %v944_v34 = vpop.f32.mrf.mxu0 }
 0x106   : > { %v951_v35 = vadd.f32 %v944_v34, %v883_v31 }
 0x107   : > { %v1208_v36 = vpop.f32.mrf.mxu0 }
 0x108   : > { %954 = vst.msk [vmem:[%s262_s30] sm:$0xff] %vm953_vm4, %v951_v35  ;;  %v967_v39 = vmul.f32 %v951_v35, %v951_v35  ;;  %v956_v42 = vsel %vm953_vm4, %v951_v35, 0.0 }
 0x109   : > { %v947_v38 = vpop.f32.mrf.mxu0 }
 0x10a   : > { %v952_v40 = vadd.f32 %v947_v38, %v884_v37  ;;  %v969_v46 = vsel %vm953_vm4, %v967_v39, 0.0 }
 0x10b   : > { %v1209_v41 = vpop.f32.mrf.mxu0 }
 0x10c   : > { %955 = vst.msk [vmem:[%s262_s30 + $0x8] sm:$0xff] %vm953_vm4, %v952_v40  ;;  %v957_v43 = vsel %vm953_vm4, %v952_v40, 0.0  ;;  %v968_v44 = vmul.f32 %v952_v40, %v952_v40 }
 0x10d   : > { %v958_v45 = vadd.f32 %v957_v43, %v956_v42 }
 0x10e   : > { %v970_v47 = vsel %vm953_vm4, %v968_v44, 0.0 }
 0x10f   : > { %v959_v48 = vrot.slane %v958_v45, 4  ;;  %v971_v49 = vadd.f32 %v970_v47, %v969_v46 }
 0x111   : > { %v960_v50 = vadd.f32 %v959_v48, %v958_v45  ;;  %v972_v51 = vrot.slane %v971_v49, 4 }
 0x113   : > { %v961_v52 = vrot.slane %v960_v50, 2  ;;  %v973_v53 = vadd.f32 %v972_v51, %v971_v49 }
 0x115   : > { %v962_v54 = vadd.f32 %v961_v52, %v960_v50  ;;  %v974_v55 = vrot.slane %v973_v53, 2 }
 0x117   : > { %v963_v56 = vrot.slane %v962_v54, 1  ;;  %v975_v57 = vadd.f32 %v974_v55, %v973_v53 }
 0x119   : > { %v964_v58 = vadd.f32 %v963_v56, %v962_v54  ;;  %v976_v59 = vrot.slane %v975_v57, 1 }
 0x11b   : > { %966 = vst.msk [vmem:[%s265_s9] sm:$0x1] %vm965_vm5, %v964_v58  ;;  %v977_v60 = vadd.f32 %v976_v59, %v975_v57 }
 0x11d   : > { %978 = vst.msk [vmem:[%s268_s12] sm:$0x1] %vm965_vm5, %v977_v60 }
 0x11e PF: > { %s17_s21 = sadd.s32 1, %s1226_s21  }
 0x11f   : > { %p14_p4 = scmp.ge.s32.totalorder %s17_s21, 4  }
 0x121   :  { %16 = sbr.rel (!%p14_p4) target bundleno = 1 (0x1), region = 133 }

</bundles_post_ra>
